<compile_context>
chip_gen: v5e
topology: v5e:2x2
jax: 0.10.0
libtpu: 0.0.40
codegen_flags: <defaults>
</compile_context>

<pallas_src>
import functools

import jax
import jax.numpy as jnp
from jax.experimental import pallas as pl
from jax.experimental.pallas import tpu as pltpu


def _round_up(x, m):
    return ((x + m - 1) // m) * m


def _pick_row_tile(h, max_rows):
    """Largest divisor of h that is <= max_rows (>= 1)."""
    best = 1
    for t in range(1, min(h, max_rows) + 1):
        if h % t == 0:
            best = t
    return best


# ---------------------------------------------------------------------------
# Fused Pallas kernel: conv (KxK 'same') -> ReLU -> global avg pool -> Linear
# ---------------------------------------------------------------------------
def _fused_forward_kernel(xs_ref, wtap_ref, wfc_ref, b_ref, o_ref, acc_ref,
                          *, k, out_w, inv_hw):
    """One (batch, row-tile) grid step.

    xs_ref : [k, th, Wp, Cin]   k vertically-shifted, width-padded input row tiles
    wtap_ref: [k*k, Cin, Cpad]  conv weight taps (Cout zero-padded to Cpad)
    wfc_ref : [Cpad, Tpad]      classifier weight (transposed, zero-padded)
    b_ref   : [1, Tpad]         classifier bias (zero-padded)
    o_ref   : [1, 1, Tpad]      logits (written only on the last row-tile step)
    acc_ref : [1, Cpad]         running relu-sum accumulator (VMEM scratch)
    """
    l = pl.program_id(1)

    @pl.when(l == 0)
    def _init():
        acc_ref[...] = jnp.zeros_like(acc_ref)

    th = xs_ref.shape[1]
    cin = xs_ref.shape[3]

    # Conv for the whole row tile: accumulate k*k tap matmuls with M = th*W.
    conv = None
    for ki in range(k):
        for kj in range(k):
            lhs = xs_ref[ki, :, kj:kj + out_w, :].reshape(th * out_w, cin)
            part = jnp.dot(lhs, wtap_ref[ki * k + kj],
                           preferred_element_type=jnp.float32)      # [th*W, Cpad]
            conv = part if conv is None else conv + part

    f = jnp.maximum(conv, 0.0)                                       # ReLU
    acc_ref[...] += jnp.sum(f, axis=0, keepdims=True)                # partial pool

    @pl.when(l == pl.num_programs(1) - 1)
    def _finalize():
        pooled = acc_ref[...] * inv_hw                               # global avg pool
        o_ref[0] = (jnp.dot(pooled, wfc_ref[...],
                            preferred_element_type=jnp.float32) + b_ref[...])


# ---------------------------------------------------------------------------
# Model wrapper
# ---------------------------------------------------------------------------
class TorchVisionModelPallas:
    """JAX/Pallas re-implementation of TorchVisionModel.forward (non-ResNet path)."""

    def __init__(self, in_channels, num_ftrs, tasks, model_uncertainty=False,
                 kernel_size=3, seed=0, tile_rows=8):
        self.tasks = tasks
        self.model_uncertainty = model_uncertainty
        num_outputs = 3 * len(tasks) if model_uncertainty else len(tasks)
        print('Number of tasks:', num_outputs)

        k = kernel_size
        key = jax.random.PRNGKey(seed)
        k_conv_w, k_fc_w, k_fc_b = jax.random.split(key, 3)

        # "features": Conv2d(in_channels, num_ftrs, k, stride=1, padding=k//2),
        # PyTorch layout [Cout, Cin, K, K].
        self.conv_w = (jax.random.normal(
            k_conv_w, (num_ftrs, in_channels, k, k), jnp.float32)
            * (1.0 / (in_channels * k * k) ** 0.5))
        # classifier: Linear(num_ftrs, num_outputs)  (PyTorch layout [T, C]).
        self.fc_w = (jax.random.normal(
            k_fc_w, (num_outputs, num_ftrs), jnp.float32)
            * (1.0 / num_ftrs ** 0.5))
        self.fc_b = jax.random.normal(k_fc_b, (num_outputs,), jnp.float32) * 0.01

        self.in_channels = in_channels
        self.num_ftrs = num_ftrs
        self.num_outputs = num_outputs
        self.kernel_size = k
        self.tile_rows = tile_rows

        # Lane-dense padding: matmul result dims are multiples of 128.
        self.cpad = _round_up(num_ftrs, 128)
        self.tpad = _round_up(num_outputs, 128)

        # Conv weight as per-tap matrices [k*k, Cin, Cpad] (Cout zero-padded).
        w_taps = jnp.transpose(self.conv_w, (2, 3, 1, 0))            # [k, k, Cin, Cout]
        w_taps = jnp.pad(w_taps, ((0, 0), (0, 0), (0, 0),
                                  (0, self.cpad - num_ftrs)))
        self.conv_w_taps = w_taps.reshape(k * k, in_channels, self.cpad)

        # Classifier transposed + zero-padded to [Cpad, Tpad] / [1, Tpad].
        w_head = jnp.zeros((self.cpad, self.tpad), jnp.float32)
        self.fc_w_pad = w_head.at[:num_ftrs, :num_outputs].set(self.fc_w.T)
        b_head = jnp.zeros((1, self.tpad), jnp.float32)
        self.fc_b_pad = b_head.at[0, :num_outputs].set(self.fc_b)

    # ---------------- Pallas call ----------------
    def _fused_forward(self, xs, n, h, w):
        k = self.kernel_size
        p = k // 2
        wp = w + 2 * p
        cin = self.in_channels
        cpad, tpad = self.cpad, self.tpad
        th = _pick_row_tile(h, self.tile_rows)
        kernel = functools.partial(_fused_forward_kernel, k=k, out_w=w,
                                   inv_hw=1.0 / float(h * w))
        out = pl.pallas_call(
            kernel,
            out_shape=jax.ShapeDtypeStruct((n, 1, tpad), jnp.float32),
            grid=(n, h // th),
            in_specs=[
                pl.BlockSpec((k, th, wp, cin), lambda b, l: (b, l, 0, 0)),
                pl.BlockSpec((k * k, cin, cpad), lambda b, l: (0, 0, 0)),
                pl.BlockSpec((cpad, tpad), lambda b, l: (0, 0)),
                pl.BlockSpec((1, tpad), lambda b, l: (0, 0)),
            ],
            out_specs=pl.BlockSpec((1, 1, tpad), lambda b, l: (b, 0, 0)),
            scratch_shapes=[pltpu.VMEM((1, cpad), jnp.float32)],
            compiler_params=pltpu.CompilerParams(
                dimension_semantics=("parallel", "arbitrary")),
        )(xs, self.conv_w_taps, self.fc_w_pad, self.fc_b_pad)
        return out[:, 0, :]

    # ---------------- forward ----------------
    @functools.partial(jax.jit, static_argnums=0)
    def forward(self, x):
        # x: [N, C_in, H, W]  (NCHW, matching PyTorch)
        n, cin, h, w = x.shape
        k = self.kernel_size
        p = k // 2
        # Only the tiny Cin-channel input is relayouted/padded (single small pass).
        xh = jnp.transpose(x, (0, 2, 3, 1))                          # NHWC
        xp = jnp.pad(xh, ((0, 0), (p, p), (p, p), (0, 0)))           # [N,H+2p,W+2p,Cin]
        # k vertically-shifted views -> clean blocked H-tiling without halo DMA.
        xs = jnp.stack([xp[:, ki:ki + h] for ki in range(k)], axis=1)
        xs = xs.reshape(n * k, h, w + 2 * p, cin)                    # [N*k,H,Wp,Cin]

        logits = self._fused_forward(xs, n, h, w)                    # [N, Tpad]
        return logits[:, :self.num_outputs]                          # [N, T]

    def __call__(self, x):
        return self.forward(x)


# ---------------------------------------------------------------------------
# Pure-JAX reference for a sanity check
# ---------------------------------------------------------------------------
def _reference_forward(model, x):
    feats = jax.lax.conv_general_dilated(
        x, model.conv_w, window_strides=(1, 1), padding='SAME',
        dimension_numbers=('NCHW', 'OIHW', 'NCHW'))
    feats = jnp.maximum(feats, 0.0)
    pooled = jnp.mean(feats, axis=(2, 3))
    return pooled @ model.fc_w.T + model.fc_b


if __name__ == "__main__":
    tasks = ['Atelectasis', 'Cardiomegaly', 'Consolidation', 'Edema', 'Effusion']
    # tile_rows=8 on a 16x16 image -> 2x2 grid, exercising init/accumulate/finalize.
    model = TorchVisionModelPallas(in_channels=4, num_ftrs=32, tasks=tasks,
                                   model_uncertainty=False, seed=0, tile_rows=8)

    key = jax.random.PRNGKey(0)
    x = jax.random.normal(key, (2, 4, 16, 16), jnp.float32)   # NCHW input

    out = jax.block_until_ready(model(x))
    assert out.shape == (2, len(tasks)), out.shape

    ref = _reference_forward(model, x)
    assert jnp.allclose(out, ref, atol=1e-4, rtol=1e-4), \
        float(jnp.max(jnp.abs(out - ref)))

    print("KERNEL_OK")
</pallas_src>

<mosaic_0001>
module attributes {stable_mosaic.version = 11 : i64} {
  func.func @_fused_forward_kernel(%arg0: i32, %arg1: i32, %arg2: memref<3x8x18x4xf32, #tpu.memory_space<vmem>>, %arg3: memref<9x4x128xf32, #tpu.memory_space<vmem>>, %arg4: memref<128x128xf32, #tpu.memory_space<vmem>>, %arg5: memref<1x128xf32, #tpu.memory_space<vmem>>, %arg6: memref<1x1x128xf32, #tpu.memory_space<vmem>>, %arg7: memref<1x128xf32, #tpu.memory_space<vmem>>) attributes {dimension_semantics = [#tpu.dimension_semantics<parallel>, #tpu.dimension_semantics<arbitrary>], iteration_bounds = array<i64: 2, 2>, scalar_prefetch = 0 : i64, scratch_operands = 1 : i64, tpu.core_type = #tpu.core_type<tc>, window_params = [{transform_indices = @transform_0, window_bounds = array<i64: 3, 8, 18, 4>}, {pipeline_mode = #tpu.pipeline_mode<synchronous>, transform_indices = @transform_1, window_bounds = array<i64: 9, 4, 128>}, {pipeline_mode = #tpu.pipeline_mode<synchronous>, transform_indices = @transform_2, window_bounds = array<i64: 128, 128>}, {pipeline_mode = #tpu.pipeline_mode<synchronous>, transform_indices = @transform_3, window_bounds = array<i64: 1, 128>}, {transform_indices = @transform_4, window_bounds = array<i64: 1, 1, 128>}]} {
    %c0_i32 = arith.constant 0 : i32
    %0 = arith.cmpi eq, %arg1, %c0_i32 : i32
    %1 = arith.extui %0 : i1 to i32
    %c0_i32_0 = arith.constant 0 : i32
    %2 = arith.cmpi ne, %1, %c0_i32_0 : i32
    scf.if %2 {
      %cst_70 = arith.constant 0.000000e+00 : f32
      %75 = vector.broadcast %cst_70 : f32 to vector<1x128xf32>
      %c0_71 = arith.constant 0 : index
      %c0_72 = arith.constant 0 : index
      %76 = vector.load %arg7[%c0_71, %c0_72] : memref<1x128xf32, #tpu.memory_space<vmem>>, vector<1x128xf32>
      tpu.vector_store %arg7[%c0_71, %c0_72], %75 {strides = array<i32>} : memref<1x128xf32, #tpu.memory_space<vmem>>, vector<1x128xf32>,
    } else {
    }
    %c0 = arith.constant 0 : index
    %c0_1 = arith.constant 0 : index
    %c0_2 = arith.constant 0 : index
    %c0_3 = arith.constant 0 : index
    %3 = vector.load %arg2[%c0, %c0_1, %c0_2, %c0_3] : memref<3x8x18x4xf32, #tpu.memory_space<vmem>>, vector<1x8x16x4xf32>
    %4 = vector.shape_cast %3 : vector<1x8x16x4xf32> to vector<8x16x4xf32>
    %5 = vector.shape_cast %4 : vector<8x16x4xf32> to vector<128x4xf32>
    %c0_4 = arith.constant 0 : index
    %c0_5 = arith.constant 0 : index
    %c0_6 = arith.constant 0 : index
    %6 = vector.load %arg3[%c0_4, %c0_5, %c0_6] : memref<9x4x128xf32, #tpu.memory_space<vmem>>, vector<1x4x128xf32>
    %7 = vector.shape_cast %6 : vector<1x4x128xf32> to vector<4x128xf32>
    %cst = arith.constant dense<0.000000e+00> : vector<128x128xf32>
    %8 = tpu.matmul %5, %7, %cst {dimension_numbers = #tpu.dot_dimension_numbers<[1], [0], [0], [1], [0, 0, 1, 1], [], []>} : vector<128x4xf32>, vector<4x128xf32>, vector<128x128xf32> -> vector<128x128xf32>
    %c0_7 = arith.constant 0 : index
    %c0_8 = arith.constant 0 : index
    %c1 = arith.constant 1 : index
    %c0_9 = arith.constant 0 : index
    %9 = vector.load %arg2[%c0_7, %c0_8, %c1, %c0_9] : memref<3x8x18x4xf32, #tpu.memory_space<vmem>>, vector<1x8x16x4xf32>
    %10 = vector.shape_cast %9 : vector<1x8x16x4xf32> to vector<8x16x4xf32>
    %11 = vector.shape_cast %10 : vector<8x16x4xf32> to vector<128x4xf32>
    %c1_10 = arith.constant 1 : index
    %c0_11 = arith.constant 0 : index
    %c0_12 = arith.constant 0 : index
    %12 = vector.load %arg3[%c1_10, %c0_11, %c0_12] : memref<9x4x128xf32, #tpu.memory_space<vmem>>, vector<1x4x128xf32>
    %13 = vector.shape_cast %12 : vector<1x4x128xf32> to vector<4x128xf32>
    %cst_13 = arith.constant dense<0.000000e+00> : vector<128x128xf32>
    %14 = tpu.matmul %11, %13, %cst_13 {dimension_numbers = #tpu.dot_dimension_numbers<[1], [0], [0], [1], [0, 0, 1, 1], [], []>} : vector<128x4xf32>, vector<4x128xf32>, vector<128x128xf32> -> vector<128x128xf32>
    %15 = arith.addf %8, %14 : vector<128x128xf32>
    %c0_14 = arith.constant 0 : index
    %c0_15 = arith.constant 0 : index
    %c2 = arith.constant 2 : index
    %c0_16 = arith.constant 0 : index
    %16 = vector.load %arg2[%c0_14, %c0_15, %c2, %c0_16] : memref<3x8x18x4xf32, #tpu.memory_space<vmem>>, vector<1x8x16x4xf32>
    %17 = vector.shape_cast %16 : vector<1x8x16x4xf32> to vector<8x16x4xf32>
    %18 = vector.shape_cast %17 : vector<8x16x4xf32> to vector<128x4xf32>
    %c2_17 = arith.constant 2 : index
    %c0_18 = arith.constant 0 : index
    %c0_19 = arith.constant 0 : index
    %19 = vector.load %arg3[%c2_17, %c0_18, %c0_19] : memref<9x4x128xf32, #tpu.memory_space<vmem>>, vector<1x4x128xf32>
    %20 = vector.shape_cast %19 : vector<1x4x128xf32> to vector<4x128xf32>
    %cst_20 = arith.constant dense<0.000000e+00> : vector<128x128xf32>
    %21 = tpu.matmul %18, %20, %cst_20 {dimension_numbers = #tpu.dot_dimension_numbers<[1], [0], [0], [1], [0, 0, 1, 1], [], []>} : vector<128x4xf32>, vector<4x128xf32>, vector<128x128xf32> -> vector<128x128xf32>
    %22 = arith.addf %15, %21 : vector<128x128xf32>
    %c1_21 = arith.constant 1 : index
    %c0_22 = arith.constant 0 : index
    %c0_23 = arith.constant 0 : index
    %c0_24 = arith.constant 0 : index
    %23 = vector.load %arg2[%c1_21, %c0_22, %c0_23, %c0_24] : memref<3x8x18x4xf32, #tpu.memory_space<vmem>>, vector<1x8x16x4xf32>
    %24 = vector.shape_cast %23 : vector<1x8x16x4xf32> to vector<8x16x4xf32>
    %25 = vector.shape_cast %24 : vector<8x16x4xf32> to vector<128x4xf32>
    %c3 = arith.constant 3 : index
    %c0_25 = arith.constant 0 : index
    %c0_26 = arith.constant 0 : index
    %26 = vector.load %arg3[%c3, %c0_25, %c0_26] : memref<9x4x128xf32, #tpu.memory_space<vmem>>, vector<1x4x128xf32>
    %27 = vector.shape_cast %26 : vector<1x4x128xf32> to vector<4x128xf32>
    %cst_27 = arith.constant dense<0.000000e+00> : vector<128x128xf32>
    %28 = tpu.matmul %25, %27, %cst_27 {dimension_numbers = #tpu.dot_dimension_numbers<[1], [0], [0], [1], [0, 0, 1, 1], [], []>} : vector<128x4xf32>, vector<4x128xf32>, vector<128x128xf32> -> vector<128x128xf32>
    %29 = arith.addf %22, %28 : vector<128x128xf32>
    %c1_28 = arith.constant 1 : index
    %c0_29 = arith.constant 0 : index
    %c1_30 = arith.constant 1 : index
    %c0_31 = arith.constant 0 : index
    %30 = vector.load %arg2[%c1_28, %c0_29, %c1_30, %c0_31] : memref<3x8x18x4xf32, #tpu.memory_space<vmem>>, vector<1x8x16x4xf32>
    %31 = vector.shape_cast %30 : vector<1x8x16x4xf32> to vector<8x16x4xf32>
    %32 = vector.shape_cast %31 : vector<8x16x4xf32> to vector<128x4xf32>
    %c4 = arith.constant 4 : index
    %c0_32 = arith.constant 0 : index
    %c0_33 = arith.constant 0 : index
    %33 = vector.load %arg3[%c4, %c0_32, %c0_33] : memref<9x4x128xf32, #tpu.memory_space<vmem>>, vector<1x4x128xf32>
    %34 = vector.shape_cast %33 : vector<1x4x128xf32> to vector<4x128xf32>
    %cst_34 = arith.constant dense<0.000000e+00> : vector<128x128xf32>
    %35 = tpu.matmul %32, %34, %cst_34 {dimension_numbers = #tpu.dot_dimension_numbers<[1], [0], [0], [1], [0, 0, 1, 1], [], []>} : vector<128x4xf32>, vector<4x128xf32>, vector<128x128xf32> -> vector<128x128xf32>
    %36 = arith.addf %29, %35 : vector<128x128xf32>
    %c1_35 = arith.constant 1 : index
    %c0_36 = arith.constant 0 : index
    %c2_37 = arith.constant 2 : index
    %c0_38 = arith.constant 0 : index
    %37 = vector.load %arg2[%c1_35, %c0_36, %c2_37, %c0_38] : memref<3x8x18x4xf32, #tpu.memory_space<vmem>>, vector<1x8x16x4xf32>
    %38 = vector.shape_cast %37 : vector<1x8x16x4xf32> to vector<8x16x4xf32>
    %39 = vector.shape_cast %38 : vector<8x16x4xf32> to vector<128x4xf32>
    %c5 = arith.constant 5 : index
    %c0_39 = arith.constant 0 : index
    %c0_40 = arith.constant 0 : index
    %40 = vector.load %arg3[%c5, %c0_39, %c0_40] : memref<9x4x128xf32, #tpu.memory_space<vmem>>, vector<1x4x128xf32>
    %41 = vector.shape_cast %40 : vector<1x4x128xf32> to vector<4x128xf32>
    %cst_41 = arith.constant dense<0.000000e+00> : vector<128x128xf32>
    %42 = tpu.matmul %39, %41, %cst_41 {dimension_numbers = #tpu.dot_dimension_numbers<[1], [0], [0], [1], [0, 0, 1, 1], [], []>} : vector<128x4xf32>, vector<4x128xf32>, vector<128x128xf32> -> vector<128x128xf32>
    %43 = arith.addf %36, %42 : vector<128x128xf32>
    %c2_42 = arith.constant 2 : index
    %c0_43 = arith.constant 0 : index
    %c0_44 = arith.constant 0 : index
    %c0_45 = arith.constant 0 : index
    %44 = vector.load %arg2[%c2_42, %c0_43, %c0_44, %c0_45] : memref<3x8x18x4xf32, #tpu.memory_space<vmem>>, vector<1x8x16x4xf32>
    %45 = vector.shape_cast %44 : vector<1x8x16x4xf32> to vector<8x16x4xf32>
    %46 = vector.shape_cast %45 : vector<8x16x4xf32> to vector<128x4xf32>
    %c6 = arith.constant 6 : index
    %c0_46 = arith.constant 0 : index
    %c0_47 = arith.constant 0 : index
    %47 = vector.load %arg3[%c6, %c0_46, %c0_47] : memref<9x4x128xf32, #tpu.memory_space<vmem>>, vector<1x4x128xf32>
    %48 = vector.shape_cast %47 : vector<1x4x128xf32> to vector<4x128xf32>
    %cst_48 = arith.constant dense<0.000000e+00> : vector<128x128xf32>
    %49 = tpu.matmul %46, %48, %cst_48 {dimension_numbers = #tpu.dot_dimension_numbers<[1], [0], [0], [1], [0, 0, 1, 1], [], []>} : vector<128x4xf32>, vector<4x128xf32>, vector<128x128xf32> -> vector<128x128xf32>
    %50 = arith.addf %43, %49 : vector<128x128xf32>
    %c2_49 = arith.constant 2 : index
    %c0_50 = arith.constant 0 : index
    %c1_51 = arith.constant 1 : index
    %c0_52 = arith.constant 0 : index
    %51 = vector.load %arg2[%c2_49, %c0_50, %c1_51, %c0_52] : memref<3x8x18x4xf32, #tpu.memory_space<vmem>>, vector<1x8x16x4xf32>
    %52 = vector.shape_cast %51 : vector<1x8x16x4xf32> to vector<8x16x4xf32>
    %53 = vector.shape_cast %52 : vector<8x16x4xf32> to vector<128x4xf32>
    %c7 = arith.constant 7 : index
    %c0_53 = arith.constant 0 : index
    %c0_54 = arith.constant 0 : index
    %54 = vector.load %arg3[%c7, %c0_53, %c0_54] : memref<9x4x128xf32, #tpu.memory_space<vmem>>, vector<1x4x128xf32>
    %55 = vector.shape_cast %54 : vector<1x4x128xf32> to vector<4x128xf32>
    %cst_55 = arith.constant dense<0.000000e+00> : vector<128x128xf32>
    %56 = tpu.matmul %53, %55, %cst_55 {dimension_numbers = #tpu.dot_dimension_numbers<[1], [0], [0], [1], [0, 0, 1, 1], [], []>} : vector<128x4xf32>, vector<4x128xf32>, vector<128x128xf32> -> vector<128x128xf32>
    %57 = arith.addf %50, %56 : vector<128x128xf32>
    %c2_56 = arith.constant 2 : index
    %c0_57 = arith.constant 0 : index
    %c2_58 = arith.constant 2 : index
    %c0_59 = arith.constant 0 : index
    %58 = vector.load %arg2[%c2_56, %c0_57, %c2_58, %c0_59] : memref<3x8x18x4xf32, #tpu.memory_space<vmem>>, vector<1x8x16x4xf32>
    %59 = vector.shape_cast %58 : vector<1x8x16x4xf32> to vector<8x16x4xf32>
    %60 = vector.shape_cast %59 : vector<8x16x4xf32> to vector<128x4xf32>
    %c8 = arith.constant 8 : index
    %c0_60 = arith.constant 0 : index
    %c0_61 = arith.constant 0 : index
    %61 = vector.load %arg3[%c8, %c0_60, %c0_61] : memref<9x4x128xf32, #tpu.memory_space<vmem>>, vector<1x4x128xf32>
    %62 = vector.shape_cast %61 : vector<1x4x128xf32> to vector<4x128xf32>
    %cst_62 = arith.constant dense<0.000000e+00> : vector<128x128xf32>
    %63 = tpu.matmul %60, %62, %cst_62 {dimension_numbers = #tpu.dot_dimension_numbers<[1], [0], [0], [1], [0, 0, 1, 1], [], []>} : vector<128x4xf32>, vector<4x128xf32>, vector<128x128xf32> -> vector<128x128xf32>
    %64 = arith.addf %57, %63 : vector<128x128xf32>
    %cst_63 = arith.constant 0.000000e+00 : f32
    %65 = vector.broadcast %cst_63 : f32 to vector<128x128xf32>
    %66 = arith.maximumf %64, %65 : vector<128x128xf32>
    %c0_64 = arith.constant 0 : index
    %c0_65 = arith.constant 0 : index
    %67 = vector.load %arg7[%c0_64, %c0_65] : memref<1x128xf32, #tpu.memory_space<vmem>>, vector<1x128xf32>
    %cst_66 = arith.constant dense<0.000000e+00> : vector<128xf32>
    %68 = vector.multi_reduction <add>, %66, %cst_66 [0] : vector<128x128xf32> to vector<128xf32>
    %69 = vector.shape_cast %68 : vector<128xf32> to vector<1x128xf32>
    %70 = arith.addf %67, %69 : vector<1x128xf32>
    %c0_67 = arith.constant 0 : index
    %c0_68 = arith.constant 0 : index
    %71 = vector.load %arg7[%c0_67, %c0_68] : memref<1x128xf32, #tpu.memory_space<vmem>>, vector<1x128xf32>
    tpu.vector_store %arg7[%c0_67, %c0_68], %70 {strides = array<i32>} : memref<1x128xf32, #tpu.memory_space<vmem>>, vector<1x128xf32>,
    %c1_i32 = arith.constant 1 : i32
    %72 = arith.cmpi eq, %arg1, %c1_i32 : i32
    %73 = arith.extui %72 : i1 to i32
    %c0_i32_69 = arith.constant 0 : i32
    %74 = arith.cmpi ne, %73, %c0_i32_69 : i32
    scf.if %74 {
      %c0_70 = arith.constant 0 : index
      %c0_71 = arith.constant 0 : index
      %75 = vector.load %arg7[%c0_70, %c0_71] : memref<1x128xf32, #tpu.memory_space<vmem>>, vector<1x128xf32>
      %cst_72 = arith.constant 3.906250e-03 : f32
      %76 = vector.broadcast %cst_72 : f32 to vector<1x128xf32>
      %77 = arith.mulf %75, %76 : vector<1x128xf32>
      %c0_73 = arith.constant 0 : index
      %c0_74 = arith.constant 0 : index
      %78 = vector.load %arg4[%c0_73, %c0_74] : memref<128x128xf32, #tpu.memory_space<vmem>>, vector<128x128xf32>
      %cst_75 = arith.constant dense<0.000000e+00> : vector<1x128xf32>
      %79 = tpu.matmul %77, %78, %cst_75 {dimension_numbers = #tpu.dot_dimension_numbers<[1], [0], [0], [1], [0, 0, 1, 1], [], []>} : vector<1x128xf32>, vector<128x128xf32>, vector<1x128xf32> -> vector<1x128xf32>
      %c0_76 = arith.constant 0 : index
      %c0_77 = arith.constant 0 : index
      %80 = vector.load %arg5[%c0_76, %c0_77] : memref<1x128xf32, #tpu.memory_space<vmem>>, vector<1x128xf32>
      %81 = arith.addf %79, %80 : vector<1x128xf32>
      %c0_78 = arith.constant 0 : index
      %c0_79 = arith.constant 0 : index
      %c0_80 = arith.constant 0 : index
      %82 = vector.load %arg6[%c0_78, %c0_79, %c0_80] : memref<1x1x128xf32, #tpu.memory_space<vmem>>, vector<1x1x128xf32>
      %83 = vector.shape_cast %82 : vector<1x1x128xf32> to vector<1x128xf32>
      %84 = vector.shape_cast %81 : vector<1x128xf32> to vector<1x1x128xf32>
      tpu.vector_store %arg6[%c0_78, %c0_79, %c0_80], %84 {strides = array<i32>} : memref<1x1x128xf32, #tpu.memory_space<vmem>>, vector<1x1x128xf32>,
    } else {
    }
    return
  }
  func.func @transform_0(%arg0: i32, %arg1: i32) -> (i32, i32, i32, i32) {
    %c0_i32 = arith.constant 0 : i32
    %c0_i32_0 = arith.constant 0 : i32
    %c0_i32_1 = arith.constant 0 : i32
    return %arg0, %arg1, %c0_i32, %c0_i32_0 : i32, i32, i32, i32
  }
  func.func @transform_1(%arg0: i32, %arg1: i32) -> (i32, i32, i32) {
    %c0_i32 = arith.constant 0 : i32
    %c0_i32_0 = arith.constant 0 : i32
    %c0_i32_1 = arith.constant 0 : i32
    %c0_i32_2 = arith.constant 0 : i32
    return %c0_i32, %c0_i32_0, %c0_i32_1 : i32, i32, i32
  }
  func.func @transform_2(%arg0: i32, %arg1: i32) -> (i32, i32) {
    %c0_i32 = arith.constant 0 : i32
    %c0_i32_0 = arith.constant 0 : i32
    %c0_i32_1 = arith.constant 0 : i32
    return %c0_i32, %c0_i32_0 : i32, i32
  }
  func.func @transform_3(%arg0: i32, %arg1: i32) -> (i32, i32) {
    %c0_i32 = arith.constant 0 : i32
    %c0_i32_0 = arith.constant 0 : i32
    %c0_i32_1 = arith.constant 0 : i32
    return %c0_i32, %c0_i32_0 : i32, i32
  }
  func.func @transform_4(%arg0: i32, %arg1: i32) -> (i32, i32, i32) {
    %c0_i32 = arith.constant 0 : i32
    %c0_i32_0 = arith.constant 0 : i32
    %c0_i32_1 = arith.constant 0 : i32
    return %arg0, %c0_i32, %c0_i32_0 : i32, i32, i32
  }
}

</mosaic_0001>

<bundles_post_ra>
// kernel: forward.1
= control target key start
LH: loop header
LB: loop body
LE: loop exit
PB: predicated region body
PF: predicated region fallthrough
CT: control target
= control target key end

     0   :  { %s3309_s0 = inlined_call_operand.vmem [shape: f32[6,16,18,4], index: 0, kind: input, shape index: {}]   ;;  %s3310_s1 = inlined_call_operand.vmem [shape: f32[9,4,128], index: 1, kind: input, shape index: {}]   ;;  %s3311_s2 = inlined_call_operand.vmem [shape: f32[128,128], index: 2, kind: input, shape index: {}]   ;;  %s3312_s3 = inlined_call_operand.vmem [shape: f32[1,128], index: 3, kind: input, shape index: {}]   ;;  %s3313_s4 = inlined_call_operand.hbm [shape: f32[2,1,128], index: 4, kind: output, shape index: {}]  }
   0x1   :  { %3314 = sst [smem:[#allocation7_spill]] %s3309_s0 }
   0x2   :  { %9 = vsyncpa [#allocation5], 0 }
   0x3   :  { %11 = vsyncpa [#allocation5 + $0x1], 0  ;;  %s2536_s15 = smov 0   ;;  %s2538_s16 = smov 0  }
   0x4   :  { %s2540_s17 = smov 0   ;;  %s2542_s18 = smov 0  }
   0x5   :  { %s2544_s19 = smov 0   ;;  %s2546_s20 = smov 0  }
   0x6   :  { %s2548_s21 = smov 0   ;;  %s2550_s22 = smov 0  }
   0x7   :  { %s2552_s23 = smov 0   ;;  %s2554_s24 = smov 0  }
   0x8 LB: > { %s2033_s25 = sadd.s32 4294967295, %s2508_s24   ;;  %s2034_s26 = sadd.s32 4294967294, %s2508_s24   ;;  %s2508_s24 = sphi %s2554_s24, %s17_s24   ;;  %s2504_s23 = sphi %s2552_s23, %s3327_s23   ;;  %s2500_s22 = sphi %s2550_s22, %s3326_s22   ;;  %s2496_s21 = sphi %s2548_s21, %s3325_s21   ;;  %s2492_s20 = sphi %s2546_s20, %s3324_s20   ;;  %s2488_s19 = sphi %s2544_s19, %s3323_s19   ;;  %s2484_s18 = sphi %s2542_s18, %s3322_s18   ;;  %s2480_s17 = sphi %s2540_s17, %s3321_s17   ;;  %s2476_s16 = sphi %s2538_s16, %s3320_s16   ;;  %s2472_s15 = sphi %s2536_s15, %s3319_s15  }
   0x9   : > { %s26_s27 = sadd.s32 1, %s2500_s22  ;;  %s29_s28 = sadd.s32 1, %s2504_s23 }
   0xa   : > { %p27_p0 = scmp.ge.s32.totalorder %s26_s27, 2  ;;  %s38_s29 = sadd.s32 1, %s2488_s19 }
   0xb   : > { %p45_p1 = scmp.ne.s32.totalorder %s2488_s19, %s2484_s18  ;;  %p46_p2 = scmp.eq.s32.totalorder %s2508_s24, 0 }
   0xc   : > { %s3329_s27 = smov (%p27_p0, %s26_s27), 0  ;;  %s3331_s28 = smov (!%p27_p0, %s29_s28), %s2504_s23 }
   0xd   : > { %s34_s30 = ssub.s32 %s2500_s22, %s3329_s27  ;;  %p2599_p3 = por %p46_p2, %p45_p1 }
   0xe   : > { %p31_p4 = scmp.ge.s32.totalorder %s3331_s28, 2  ;;  %s127_s6 = sadd.s32 1, %s2480_s17 }
   0xf   : > { %p137_p5 = scmp.ne.s32.totalorder %s2480_s17, %s2476_s16  ;;  %p138_p6 = scmp.eq.s32.totalorder %s2033_s25, 3 }
  0x10   : > { %s3333_s28 = smov (%p31_p4, %s3331_s28), 0  ;;  %p143_p8 = scmp.ne.s32.totalorder %s2476_s16, %s2472_s15 }
  0x11   : > { %p2608_p7 = por %p138_p6, %p137_p5  ;;  %s33_s8 = ssub.s32 %s2504_s23, %s3333_s28 }
  0x12   : > { %p144_p9 = scmp.eq.s32.totalorder %s2034_s26, 3  ;;  %s35_s9 = sor.u32 %s34_s30, %s33_s8 }
  0x13   : > { %p125_p10 = scmp.eq.s32.totalorder %s33_s8, 0  ;;  %p36_p11 = scmp.eq.s32.totalorder %s35_s9, 0 }
  0x14   : > { %p2616_p12 = por %p144_p9, %p143_p8  ;;  %p2036_p13 = scmp.ge.s32.totalorder %s2508_s24, 4 }
  0x15   : > { %s2621_s11 = scalar_select %p125_p10, %s2480_s17, %s127_s6  }
  0x16   : > { %s2624_s12 = scalar_select %p36_p11, %s2488_s19, %s38_s29  }
  0x17   : > { %169 = sbr.rel (%p2036_p13) target bundleno = 109 (0x6d), region = 28 }
  0x1c   : > { %172 = sbr.rel (!%p2599_p3) target bundleno = 109 (0x6d), region = 32  ;;  %s174_s13 = sand.u32 (%p2599_p3), 1, %s2488_s19  }
  0x1d   : > { %s2305_s14 = smul.u32 (%p2599_p3), 576, %s174_s13  ;;  %s3318_s0 = sld [smem:[#allocation7_spill]] (%p2599_p3) }
  0x1e   : > { %s2306_s25 = smul.u32 (%p2599_p3), 24, %s2500_s22 }
  0x1f   : > { %s2315_s26 = smul.u32 (%p2599_p3), 144, %s2504_s23  ;;  %s2640_s5 = scalar_lea.vmem (%p2599_p3), [#allocation3], %s2305_s14 }
  0x21   : > { %s181_s30 = sadd.s32 %s2315_s26, %s2306_s25 }
  0x22   : > { %s2039_s8 = sshll.u32 %s181_s30, 3 }
  0x23   : > { %s2635_s29 = scalar_lea.vmem %s3318_s0, %s2039_s8 }
  0x24   : > { %v354_v0 = vld [vmem:[%s2635_s29] sm:$0xff]  ;;  %v356_v1 = vld [vmem:[%s2635_s29 + $0x8] sm:$0xff]  ;;  %v358_v2 = vld [vmem:[%s2635_s29 + $0x10] sm:$0xff] }
  0x25   : > { %355 = vst [vmem:[%s2640_s5] sm:$0xff] %v354_v0  ;;  %v360_v3 = vld [vmem:[%s2635_s29 + $0x18] sm:$0xff]  ;;  %v362_v4 = vld [vmem:[%s2635_s29 + $0x20] sm:$0xff]  ;;  %v364_v5 = vld [vmem:[%s2635_s29 + $0x28] sm:$0xff] }
  0x26   : > { %357 = vst [vmem:[%s2640_s5 + $0x8] sm:$0xff] %v356_v1  ;;  %v366_v6 = vld [vmem:[%s2635_s29 + $0x30] sm:$0xff]  ;;  %v368_v7 = vld [vmem:[%s2635_s29 + $0x38] sm:$0xff]  ;;  %v370_v8 = vld [vmem:[%s2635_s29 + $0x40] sm:$0xff] }
  0x27   : > { %359 = vst [vmem:[%s2640_s5 + $0x10] sm:$0xff] %v358_v2  ;;  %v372_v9 = vld [vmem:[%s2635_s29 + $0x48] sm:$0xff]  ;;  %v374_v10 = vld [vmem:[%s2635_s29 + $0x50] sm:$0xff]  ;;  %v376_v11 = vld [vmem:[%s2635_s29 + $0x58] sm:$0xff] }
  0x28   : > { %361 = vst [vmem:[%s2640_s5 + $0x18] sm:$0xff] %v360_v3  ;;  %v378_v12 = vld [vmem:[%s2635_s29 + $0x60] sm:$0xff]  ;;  %v380_v13 = vld [vmem:[%s2635_s29 + $0x68] sm:$0xff]  ;;  %v382_v14 = vld [vmem:[%s2635_s29 + $0x70] sm:$0xff] }
  0x29   : > { %363 = vst [vmem:[%s2640_s5 + $0x20] sm:$0xff] %v362_v4  ;;  %v384_v15 = vld [vmem:[%s2635_s29 + $0x78] sm:$0xff]  ;;  %v386_v16 = vld [vmem:[%s2635_s29 + $0x80] sm:$0xff]  ;;  %v388_v17 = vld [vmem:[%s2635_s29 + $0x88] sm:$0xff] }
  0x2a   : > { %365 = vst [vmem:[%s2640_s5 + $0x28] sm:$0xff] %v364_v5  ;;  %v390_v18 = vld [vmem:[%s2635_s29 + $0x90] sm:$0xff]  ;;  %v392_v19 = vld [vmem:[%s2635_s29 + $0x98] sm:$0xff]  ;;  %v394_v20 = vld [vmem:[%s2635_s29 + $0xa0] sm:$0xff] }
  0x2b   : > { %367 = vst [vmem:[%s2640_s5 + $0x30] sm:$0xff] %v366_v6  ;;  %v396_v21 = vld [vmem:[%s2635_s29 + $0xa8] sm:$0xff]  ;;  %v398_v22 = vld [vmem:[%s2635_s29 + $0xb0] sm:$0xff]  ;;  %v400_v23 = vld [vmem:[%s2635_s29 + $0xb8] sm:$0xff] }
  0x2c   : > { %369 = vst [vmem:[%s2640_s5 + $0x38] sm:$0xff] %v368_v7  ;;  %v402_v24 = vld [vmem:[%s2635_s29 + $0x180] sm:$0xff]  ;;  %v404_v25 = vld [vmem:[%s2635_s29 + $0x188] sm:$0xff]  ;;  %v406_v26 = vld [vmem:[%s2635_s29 + $0x190] sm:$0xff] }
  0x2d   : > { %371 = vst [vmem:[%s2640_s5 + $0x40] sm:$0xff] %v370_v8  ;;  %v408_v27 = vld [vmem:[%s2635_s29 + $0x198] sm:$0xff]  ;;  %v410_v28 = vld [vmem:[%s2635_s29 + $0x1a0] sm:$0xff]  ;;  %v412_v29 = vld [vmem:[%s2635_s29 + $0x1a8] sm:$0xff] }
  0x2e   : > { %373 = vst [vmem:[%s2640_s5 + $0x48] sm:$0xff] %v372_v9  ;;  %v414_v30 = vld [vmem:[%s2635_s29 + $0x1b0] sm:$0xff]  ;;  %v416_v31 = vld [vmem:[%s2635_s29 + $0x1b8] sm:$0xff]  ;;  %v418_v32 = vld [vmem:[%s2635_s29 + $0x1c0] sm:$0xff] }
  0x2f   : > { %375 = vst [vmem:[%s2640_s5 + $0x50] sm:$0xff] %v374_v10  ;;  %v420_v33 = vld [vmem:[%s2635_s29 + $0x1c8] sm:$0xff]  ;;  %v422_v34 = vld [vmem:[%s2635_s29 + $0x1d0] sm:$0xff]  ;;  %v424_v35 = vld [vmem:[%s2635_s29 + $0x1d8] sm:$0xff] }
  0x30   : > { %377 = vst [vmem:[%s2640_s5 + $0x58] sm:$0xff] %v376_v11  ;;  %v426_v36 = vld [vmem:[%s2635_s29 + $0x1e0] sm:$0xff]  ;;  %v428_v37 = vld [vmem:[%s2635_s29 + $0x1e8] sm:$0xff]  ;;  %v430_v38 = vld [vmem:[%s2635_s29 + $0x1f0] sm:$0xff] }
  0x31   : > { %379 = vst [vmem:[%s2640_s5 + $0x60] sm:$0xff] %v378_v12  ;;  %v432_v39 = vld [vmem:[%s2635_s29 + $0x1f8] sm:$0xff]  ;;  %v434_v40 = vld [vmem:[%s2635_s29 + $0x200] sm:$0xff]  ;;  %v436_v41 = vld [vmem:[%s2635_s29 + $0x208] sm:$0xff] }
  0x32   : > { %381 = vst [vmem:[%s2640_s5 + $0x68] sm:$0xff] %v380_v13  ;;  %v438_v42 = vld [vmem:[%s2635_s29 + $0x210] sm:$0xff]  ;;  %v440_v43 = vld [vmem:[%s2635_s29 + $0x218] sm:$0xff]  ;;  %v442_v44 = vld [vmem:[%s2635_s29 + $0x220] sm:$0xff] }
  0x33   : > { %383 = vst [vmem:[%s2640_s5 + $0x70] sm:$0xff] %v382_v14  ;;  %v444_v45 = vld [vmem:[%s2635_s29 + $0x228] sm:$0xff]  ;;  %v446_v46 = vld [vmem:[%s2635_s29 + $0x230] sm:$0xff]  ;;  %v448_v47 = vld [vmem:[%s2635_s29 + $0x238] sm:$0xff] }
  0x34   : > { %385 = vst [vmem:[%s2640_s5 + $0x78] sm:$0xff] %v384_v15  ;;  %v450_v48 = vld [vmem:[%s2635_s29 + $0x300] sm:$0xff]  ;;  %v452_v49 = vld [vmem:[%s2635_s29 + $0x308] sm:$0xff]  ;;  %v454_v50 = vld [vmem:[%s2635_s29 + $0x310] sm:$0xff] }
  0x35   : > { %387 = vst [vmem:[%s2640_s5 + $0x80] sm:$0xff] %v386_v16  ;;  %v456_v51 = vld [vmem:[%s2635_s29 + $0x318] sm:$0xff]  ;;  %v458_v52 = vld [vmem:[%s2635_s29 + $0x320] sm:$0xff]  ;;  %v460_v53 = vld [vmem:[%s2635_s29 + $0x328] sm:$0xff] }
  0x36   : > { %389 = vst [vmem:[%s2640_s5 + $0x88] sm:$0xff] %v388_v17  ;;  %v462_v54 = vld [vmem:[%s2635_s29 + $0x330] sm:$0xff]  ;;  %v464_v55 = vld [vmem:[%s2635_s29 + $0x338] sm:$0xff]  ;;  %v466_v56 = vld [vmem:[%s2635_s29 + $0x340] sm:$0xff] }
  0x37   : > { %391 = vst [vmem:[%s2640_s5 + $0x90] sm:$0xff] %v390_v18  ;;  %v468_v57 = vld [vmem:[%s2635_s29 + $0x348] sm:$0xff]  ;;  %v470_v58 = vld [vmem:[%s2635_s29 + $0x350] sm:$0xff]  ;;  %v472_v59 = vld [vmem:[%s2635_s29 + $0x358] sm:$0xff] }
  0x38   : > { %393 = vst [vmem:[%s2640_s5 + $0x98] sm:$0xff] %v392_v19  ;;  %v474_v60 = vld [vmem:[%s2635_s29 + $0x360] sm:$0xff]  ;;  %v476_v61 = vld [vmem:[%s2635_s29 + $0x368] sm:$0xff]  ;;  %v478_v62 = vld [vmem:[%s2635_s29 + $0x370] sm:$0xff] }
  0x39   : > { %395 = vst [vmem:[%s2640_s5 + $0xa0] sm:$0xff] %v394_v20  ;;  %v480_v63 = vld [vmem:[%s2635_s29 + $0x378] sm:$0xff]  ;;  %v482_v0 = vld [vmem:[%s2635_s29 + $0x380] sm:$0xff]  ;;  %v484_v1 = vld [vmem:[%s2635_s29 + $0x388] sm:$0xff] }
  0x3a   : > { %397 = vst [vmem:[%s2640_s5 + $0xa8] sm:$0xff] %v396_v21  ;;  %v486_v2 = vld [vmem:[%s2635_s29 + $0x390] sm:$0xff]  ;;  %v488_v3 = vld [vmem:[%s2635_s29 + $0x398] sm:$0xff]  ;;  %v490_v4 = vld [vmem:[%s2635_s29 + $0x3a0] sm:$0xff] }
  0x3b   : > { %399 = vst [vmem:[%s2640_s5 + $0xb0] sm:$0xff] %v398_v22  ;;  %v492_v5 = vld [vmem:[%s2635_s29 + $0x3a8] sm:$0xff]  ;;  %v494_v6 = vld [vmem:[%s2635_s29 + $0x3b0] sm:$0xff]  ;;  %v496_v7 = vld [vmem:[%s2635_s29 + $0x3b8] sm:$0xff] }
  0x3c   : > { %401 = vst [vmem:[%s2640_s5 + $0xb8] sm:$0xff] %v400_v23 }
  0x3d   : > { %403 = vst [vmem:[%s2640_s5 + $0xc0] sm:$0xff] %v402_v24 }
  0x3e   : > { %405 = vst [vmem:[%s2640_s5 + $0xc8] sm:$0xff] %v404_v25 }
  0x3f   : > { %407 = vst [vmem:[%s2640_s5 + $0xd0] sm:$0xff] %v406_v26 }
  0x40   : > { %409 = vst [vmem:[%s2640_s5 + $0xd8] sm:$0xff] %v408_v27 }
  0x41   : > { %411 = vst [vmem:[%s2640_s5 + $0xe0] sm:$0xff] %v410_v28 }
  0x42   : > { %413 = vst [vmem:[%s2640_s5 + $0xe8] sm:$0xff] %v412_v29 }
  0x43   : > { %415 = vst [vmem:[%s2640_s5 + $0xf0] sm:$0xff] %v414_v30 }
  0x44   : > { %417 = vst [vmem:[%s2640_s5 + $0xf8] sm:$0xff] %v416_v31 }
  0x45   : > { %419 = vst [vmem:[%s2640_s5 + $0x100] sm:$0xff] %v418_v32 }
  0x46   : > { %421 = vst [vmem:[%s2640_s5 + $0x108] sm:$0xff] %v420_v33 }
  0x47   : > { %423 = vst [vmem:[%s2640_s5 + $0x110] sm:$0xff] %v422_v34 }
  0x48   : > { %425 = vst [vmem:[%s2640_s5 + $0x118] sm:$0xff] %v424_v35 }
  0x49   : > { %427 = vst [vmem:[%s2640_s5 + $0x120] sm:$0xff] %v426_v36 }
  0x4a   : > { %429 = vst [vmem:[%s2640_s5 + $0x128] sm:$0xff] %v428_v37 }
  0x4b   : > { %431 = vst [vmem:[%s2640_s5 + $0x130] sm:$0xff] %v430_v38 }
  0x4c   : > { %433 = vst [vmem:[%s2640_s5 + $0x138] sm:$0xff] %v432_v39 }
  0x4d   : > { %435 = vst [vmem:[%s2640_s5 + $0x140] sm:$0xff] %v434_v40 }
  0x4e   : > { %437 = vst [vmem:[%s2640_s5 + $0x148] sm:$0xff] %v436_v41 }
  0x4f   : > { %439 = vst [vmem:[%s2640_s5 + $0x150] sm:$0xff] %v438_v42 }
  0x50   : > { %441 = vst [vmem:[%s2640_s5 + $0x158] sm:$0xff] %v440_v43 }
  0x51   : > { %443 = vst [vmem:[%s2640_s5 + $0x160] sm:$0xff] %v442_v44 }
  0x52   : > { %445 = vst [vmem:[%s2640_s5 + $0x168] sm:$0xff] %v444_v45 }
  0x53   : > { %447 = vst [vmem:[%s2640_s5 + $0x170] sm:$0xff] %v446_v46 }
  0x54   : > { %449 = vst [vmem:[%s2640_s5 + $0x178] sm:$0xff] %v448_v47 }
  0x55   : > { %451 = vst [vmem:[%s2640_s5 + $0x180] sm:$0xff] %v450_v48 }
  0x56   : > { %453 = vst [vmem:[%s2640_s5 + $0x188] sm:$0xff] %v452_v49 }
  0x57   : > { %455 = vst [vmem:[%s2640_s5 + $0x190] sm:$0xff] %v454_v50 }
  0x58   : > { %457 = vst [vmem:[%s2640_s5 + $0x198] sm:$0xff] %v456_v51 }
  0x59   : > { %459 = vst [vmem:[%s2640_s5 + $0x1a0] sm:$0xff] %v458_v52 }
  0x5a   : > { %461 = vst [vmem:[%s2640_s5 + $0x1a8] sm:$0xff] %v460_v53 }
  0x5b   : > { %463 = vst [vmem:[%s2640_s5 + $0x1b0] sm:$0xff] %v462_v54 }
  0x5c   : > { %465 = vst [vmem:[%s2640_s5 + $0x1b8] sm:$0xff] %v464_v55 }
  0x5d   : > { %467 = vst [vmem:[%s2640_s5 + $0x1c0] sm:$0xff] %v466_v56 }
  0x5e   : > { %469 = vst [vmem:[%s2640_s5 + $0x1c8] sm:$0xff] %v468_v57 }
  0x5f   : > { %471 = vst [vmem:[%s2640_s5 + $0x1d0] sm:$0xff] %v470_v58 }
  0x60   : > { %473 = vst [vmem:[%s2640_s5 + $0x1d8] sm:$0xff] %v472_v59 }
  0x61   : > { %475 = vst [vmem:[%s2640_s5 + $0x1e0] sm:$0xff] %v474_v60 }
  0x62   : > { %477 = vst [vmem:[%s2640_s5 + $0x1e8] sm:$0xff] %v476_v61 }
  0x63   : > { %479 = vst [vmem:[%s2640_s5 + $0x1f0] sm:$0xff] %v478_v62 }
  0x64   : > { %481 = vst [vmem:[%s2640_s5 + $0x1f8] sm:$0xff] %v480_v63 }
  0x65   : > { %483 = vst [vmem:[%s2640_s5 + $0x200] sm:$0xff] %v482_v0 }
  0x66   : > { %485 = vst [vmem:[%s2640_s5 + $0x208] sm:$0xff] %v484_v1 }
  0x67   : > { %487 = vst [vmem:[%s2640_s5 + $0x210] sm:$0xff] %v486_v2 }
  0x68   : > { %489 = vst [vmem:[%s2640_s5 + $0x218] sm:$0xff] %v488_v3 }
  0x69   : > { %491 = vst [vmem:[%s2640_s5 + $0x220] sm:$0xff] %v490_v4 }
  0x6a   : > { %493 = vst [vmem:[%s2640_s5 + $0x228] sm:$0xff] %v492_v5 }
  0x6b   : > { %495 = vst [vmem:[%s2640_s5 + $0x230] sm:$0xff] %v494_v6 }
  0x6c   : > { %497 = vst [vmem:[%s2640_s5 + $0x238] sm:$0xff] %v496_v7 }
  0x6d PF: > { %p2040_p0 = scmp.ge.s32.totalorder %s2508_s24, 1  ;;  %p502_p1 = scmp.lt.s32.totalorder %s2508_s24, 5 }
  0x6f   : > { %p503_p2 = pnand %p2040_p0, %p502_p1 }
  0x70   : > { %s509_s13 = sand.u32 (!%p503_p2), 1, %s2484_s18   ;;  %s531_s14 = sand.u32 (!%p503_p2), 1, %s2476_s16  }
  0x71   : > { %506 = sbr.rel (%p503_p2) target bundleno = 739 (0x2e3), region = 70  ;;  %s2791_s30 = scalar_lea.vmem (!%p503_p2), [#allocation4], %s531_s14 }
  0x72   : > { %s2308_s25 = smul.u32 (!%p503_p2), 576, %s509_s13  ;;  %p2041_p3 = scmp.ne.s32.totalorder (!%p503_p2), %s2492_s20, 0 }
  0x74   : > { %s2787_s26 = scalar_lea.vmem (!%p503_p2), [#allocation3], %s2308_s25 }
  0x76   : > { %538 = sbr.rel (%p2041_p3) target bundleno = 125 (0x7d), region = 78 }
  0x7b   : > { %v2510_v8 = vmov 0.0  }
  0x7c   : > { %539 = vst [vmem:[#allocation2] sm:$0x1] %v2510_v8 }
  0x7d PF: > { %v2042_v9 = vld [vmem:[%s3310_s1 + $0x4] sm:$0xf]  ;;  %vm624_vm0 = vcmask 1043456   ;;  %v561_v10 = vld [vmem:[%s2787_s26 + $0x31] sm:$0xff]  ;;  %vm575_vm1 = vcmask 31744   ;;  %v562_v18 = vld [vmem:[%s2787_s26 + $0x39] sm:$0xff] }
  0x7e   : > { %v565_v11 = vld [vmem:[%s2787_s26 + $0x61] sm:$0xff]  ;;  %2302 = vmatpush.msk.msra.mxu1 %vm624_vm0, %v2042_v9  ;;  %2303 = vmatpush.msk.msra.mxu2 %vm624_vm0, %v2042_v9  ;;  %v569_v13 = vld [vmem:[%s2787_s26 + $0x91] sm:$0xff]  ;;  %v2111_v14 = vld [vmem:[%s3310_s1 + $0xc] sm:$0xf]  ;;  %p2299_p4 = scmp.ne.s32.totalorder %s2492_s20, 1 }
  0x7f   : > { %v2077_v12 = vld [vmem:[%s3310_s1 + $0x8] sm:$0xf]  ;;  %2048 = vmatmul.msk.f32.vlgmr.msra.gmra.mxu1 %vm575_vm1, %v561_v10  ;;  %2052 = vmatmul.msk.f32.vlgmr.msra.gmra.mxu2 %vm575_vm1, %v565_v11  ;;  %v556_v15 = vld [vmem:[%s3310_s1] sm:$0xf]  ;;  %v2145_v17 = vld [vmem:[%s3310_s1 + $0x10] sm:$0xf] }
  0x80   : > { %2078 = vmatpush.msk.msrb.mxu2 %vm624_vm0, %v2077_v12  ;;  %2304 = vmatpush.msk.msra.mxu3 %vm624_vm0, %v2042_v9  ;;  %v557_v16 = vld [vmem:[%s2787_s26 + $0x1] sm:$0xff]  ;;  %v566_v19 = vld [vmem:[%s2787_s26 + $0x69] sm:$0xff]  ;;  %v2213_v20 = vld [vmem:[%s3310_s1 + $0x18] sm:$0xf] }
  0x81   : > { %2056 = vmatmul.msk.f32.vlgmr.msra.gmra.mxu3 %vm575_vm1, %v569_v13  ;;  %2060 = vmatpush.msk.msrb.mxu1 %vm624_vm0, %v556_v15  ;;  %v2247_v21 = vld [vmem:[%s3310_s1 + $0x1c] sm:$0xf]  ;;  %v2179_v22 = vld [vmem:[%s3310_s1 + $0x14] sm:$0xf]  ;;  %v558_v24 = vld [vmem:[%s2787_s26 + $0x9] sm:$0xff] }
  0x82   : > { %2112 = vmatpush.msk.msrb.mxu3 %vm624_vm0, %v2111_v14  ;;  %2043 = vmatpush.msk.msra.mxu0 %vm624_vm0, %v2042_v9  ;;  %v570_v23 = vld [vmem:[%s2787_s26 + $0x99] sm:$0xff]  ;;  %v563_v26 = vld [vmem:[%s2787_s26 + $0x49] sm:$0xff]  ;;  %v564_v30 = vld [vmem:[%s2787_s26 + $0x51] sm:$0xff] }
  0x83   : > { %2044 = vmatmul.msk.f32.vlgmr.msra.gmra.mxu0 %vm575_vm1, %v557_v16  ;;  %2214 = vmatpush.msk.msra.mxu2 %vm624_vm0, %v2213_v20  ;;  %v2281_v25 = vld [vmem:[%s3310_s1 + $0x20] sm:$0xf]  ;;  %v571_v28 = vld [vmem:[%s2787_s26 + $0xa9] sm:$0xff]  ;;  %v572_v32 = vld [vmem:[%s2787_s26 + $0xb1] sm:$0xff] }
  0x84   : > { %2146 = vmatpush.msk.msrb.mxu0 %vm624_vm0, %v2145_v17  ;;  %2248 = vmatpush.msk.msra.mxu3 %vm624_vm0, %v2247_v21  ;;  %v567_v27 = vld [vmem:[%s2787_s26 + $0x79] sm:$0xff]  ;;  %v568_v31 = vld [vmem:[%s2787_s26 + $0x81] sm:$0xff]  ;;  %v810_v39 = vld [vmem:[%s2787_s26 + $0xa] sm:$0xff] }
  0x85   : > { %2180 = vmatpush.msk.msra.mxu1 %vm624_vm0, %v2179_v22  ;;  %v559_v29 = vld [vmem:[%s2787_s26 + $0x19] sm:$0xff]  ;;  %v560_v33 = vld [vmem:[%s2787_s26 + $0x21] sm:$0xff]  ;;  %v2130_v41 = vld [vmem:[%s2787_s26 + $0xc9] sm:$0xff] }
  0x86   : > { %2282 = vmatpush.msk.msra.mxu0 %vm624_vm0, %v2281_v25  ;;  %v540_v34 = vld [vmem:[%s2787_s26] sm:$0xff]  ;;  %v541_v38 = vld [vmem:[%s2787_s26 + $0x8] sm:$0xff]  ;;  %v542_v42 = vld [vmem:[%s2787_s26 + $0x18] sm:$0xff] }
  0x87   : > { %2049 = vmatmul.msk.f32.gmra.mxu1 %vm575_vm1, %v562_v18  ;;  %2053 = vmatmul.msk.f32.gmra.mxu2 %vm575_vm1, %v566_v19  ;;  %v809_v35 = vld [vmem:[%s2787_s26 + $0x2] sm:$0xff]  ;;  %v811_v43 = vld [vmem:[%s2787_s26 + $0x1a] sm:$0xff]  ;;  %v544_v50 = vld [vmem:[%s2787_s26 + $0x30] sm:$0xff] }
  0x88   : > { %v2095_v36 = vld [vmem:[%s2787_s26 + $0xc0] sm:$0xff]  ;;  %v2096_v40 = vld [vmem:[%s2787_s26 + $0xc8] sm:$0xff]  ;;  %v2097_v44 = vld [vmem:[%s2787_s26 + $0xd8] sm:$0xff] }
  0x89   : > { %2057 = vmatmul.msk.f32.gmra.mxu3 %vm575_vm1, %v570_v23  ;;  %v2129_v37 = vld [vmem:[%s2787_s26 + $0xc1] sm:$0xff]  ;;  %v2131_v45 = vld [vmem:[%s2787_s26 + $0xd9] sm:$0xff]  ;;  %v2099_v52 = vld [vmem:[%s2787_s26 + $0xf0] sm:$0xff] }
  0x8a   : > { %v543_v46 = vld [vmem:[%s2787_s26 + $0x20] sm:$0xff]  ;;  %v813_v51 = vld [vmem:[%s2787_s26 + $0x32] sm:$0xff]  ;;  %v546_v58 = vld [vmem:[%s2787_s26 + $0x48] sm:$0xff] }
  0x8b   : > { %2045 = vmatmul.msk.f32.gmra.mxu0 %vm575_vm1, %v558_v24  ;;  %v812_v47 = vld [vmem:[%s2787_s26 + $0x22] sm:$0xff]  ;;  %v2133_v53 = vld [vmem:[%s2787_s26 + $0xf1] sm:$0xff]  ;;  %v814_v55 = vld [vmem:[%s2787_s26 + $0x3a] sm:$0xff] }
  0x8c   : > { %v2098_v48 = vld [vmem:[%s2787_s26 + $0xe0] sm:$0xff]  ;;  %v545_v54 = vld [vmem:[%s2787_s26 + $0x38] sm:$0xff]  ;;  %v815_v59 = vld [vmem:[%s2787_s26 + $0x4a] sm:$0xff] }
  0x8d   : > { %v2132_v49 = vld [vmem:[%s2787_s26 + $0xe1] sm:$0xff]  ;;  %v2100_v56 = vld [vmem:[%s2787_s26 + $0xf8] sm:$0xff]  ;;  %v2135_v61 = vld [vmem:[%s2787_s26 + $0x109] sm:$0xff] }
  0x8e   : > { %v2134_v57 = vld [vmem:[%s2787_s26 + $0xf9] sm:$0xff]  ;;  %v2101_v60 = vld [vmem:[%s2787_s26 + $0x108] sm:$0xff]  ;;  %v547_v62 = vld [vmem:[%s2787_s26 + $0x50] sm:$0xff] }
  0x8f   : > { %2050 = vmatmul.msk.f32.gmra.mxu1 %vm575_vm1, %v563_v26  ;;  %2054 = vmatmul.msk.f32.gmra.mxu2 %vm575_vm1, %v567_v27  ;;  %v816_v63 = vld [vmem:[%s2787_s26 + $0x52] sm:$0xff]  ;;  %v548_v2 = vld [vmem:[%s2787_s26 + $0x60] sm:$0xff]  ;;  %v549_v6 = vld [vmem:[%s2787_s26 + $0x68] sm:$0xff] }
  0x90   : > { %v2102_v0 = vld [vmem:[%s2787_s26 + $0x110] sm:$0xff]  ;;  %v817_v3 = vld [vmem:[%s2787_s26 + $0x62] sm:$0xff]  ;;  %v550_v10 = vld [vmem:[%s2787_s26 + $0x78] sm:$0xff] }
  0x91   : > { %2058 = vmatmul.msk.f32.gmra.mxu3 %vm575_vm1, %v571_v28  ;;  %v2136_v1 = vld [vmem:[%s2787_s26 + $0x111] sm:$0xff]  ;;  %v2103_v4 = vld [vmem:[%s2787_s26 + $0x120] sm:$0xff]  ;;  %v2104_v8 = vld [vmem:[%s2787_s26 + $0x128] sm:$0xff] }
  0x92   : > { %v2137_v5 = vld [vmem:[%s2787_s26 + $0x121] sm:$0xff]  ;;  %v818_v7 = vld [vmem:[%s2787_s26 + $0x6a] sm:$0xff]  ;;  %v2105_v12 = vld [vmem:[%s2787_s26 + $0x138] sm:$0xff] }
  0x93   : > { %2046 = vmatmul.msk.f32.gmra.mxu0 %vm575_vm1, %v559_v29  ;;  %v2138_v9 = vld [vmem:[%s2787_s26 + $0x129] sm:$0xff]  ;;  %v819_v11 = vld [vmem:[%s2787_s26 + $0x7a] sm:$0xff]  ;;  %v821_v20 = vld [vmem:[%s2787_s26 + $0x92] sm:$0xff] }
  0x94   : > { %v2139_v13 = vld [vmem:[%s2787_s26 + $0x139] sm:$0xff]  ;;  %v820_v15 = vld [vmem:[%s2787_s26 + $0x82] sm:$0xff]  ;;  %v552_v19 = vld [vmem:[%s2787_s26 + $0x90] sm:$0xff] }
  0x95   : > { %v551_v14 = vld [vmem:[%s2787_s26 + $0x80] sm:$0xff]  ;;  %v2107_v21 = vld [vmem:[%s2787_s26 + $0x150] sm:$0xff]  ;;  %v553_v27 = vld [vmem:[%s2787_s26 + $0x98] sm:$0xff] }
  0x96   : > { %v2106_v16 = vld [vmem:[%s2787_s26 + $0x140] sm:$0xff]  ;;  %v2141_v23 = vld [vmem:[%s2787_s26 + $0x151] sm:$0xff] }
  0x97   : > { %2051 = vmatmul.msk.f32.gmra.mxu1 %vm575_vm1, %v564_v30  ;;  %2055 = vmatmul.msk.f32.gmra.mxu2 %vm575_vm1, %v568_v31  ;;  %v2140_v17 = vld [vmem:[%s2787_s26 + $0x141] sm:$0xff]  ;;  %v2108_v29 = vld [vmem:[%s2787_s26 + $0x158] sm:$0xff] }
  0x98   : > { %v822_v28 = vld [vmem:[%s2787_s26 + $0x9a] sm:$0xff] }
  0x99   : > { %2059 = vmatmul.msk.f32.gmra.mxu3 %vm575_vm1, %v572_v32  ;;  %v2142_v31 = vld [vmem:[%s2787_s26 + $0x159] sm:$0xff] }
  0x9b   : > { %2047 = vmatmul.msk.f32.gmra.mxu0 %vm575_vm1, %v560_v33 }
  0x9f   : > { %2061 = vmatmul.msk.f32.vlgmr.msrb.gmra.mxu1 %vm575_vm1, %v540_v34  ;;  %2079 = vmatmul.msk.f32.vlgmr.msrb.gmra.mxu2 %vm575_vm1, %v809_v35  ;;  %v554_v35 = vld [vmem:[%s2787_s26 + $0xa8] sm:$0xff] }
  0xa1   : > { %2113 = vmatmul.msk.f32.vlgmr.msrb.gmra.mxu3 %vm575_vm1, %v2095_v36  ;;  %v823_v36 = vld [vmem:[%s2787_s26 + $0xaa] sm:$0xff] }
  0xa3   : > { %2147 = vmatmul.msk.f32.vlgmr.msrb.gmra.mxu0 %vm575_vm1, %v2129_v37  ;;  %v2109_v37 = vld [vmem:[%s2787_s26 + $0x168] sm:$0xff] }
  0xa7   : > { %2062 = vmatmul.msk.f32.gmra.mxu1 %vm575_vm1, %v541_v38  ;;  %2080 = vmatmul.msk.f32.gmra.mxu2 %vm575_vm1, %v810_v39  ;;  %v2143_v39 = vld [vmem:[%s2787_s26 + $0x169] sm:$0xff] }
  0xa9   : > { %2114 = vmatmul.msk.f32.gmra.mxu3 %vm575_vm1, %v2096_v40 }
  0xab   : > { %2148 = vmatmul.msk.f32.gmra.mxu0 %vm575_vm1, %v2130_v41 }
  0xaf   : > { %2063 = vmatmul.msk.f32.gmra.mxu1 %vm575_vm1, %v542_v42  ;;  %2081 = vmatmul.msk.f32.gmra.mxu2 %vm575_vm1, %v811_v43  ;;  %v555_v43 = vld [vmem:[%s2787_s26 + $0xb0] sm:$0xff] }
  0xb1   : > { %2115 = vmatmul.msk.f32.gmra.mxu3 %vm575_vm1, %v2097_v44  ;;  %v824_v44 = vld [vmem:[%s2787_s26 + $0xb2] sm:$0xff] }
  0xb3   : > { %2149 = vmatmul.msk.f32.gmra.mxu0 %vm575_vm1, %v2131_v45  ;;  %v2110_v45 = vld [vmem:[%s2787_s26 + $0x170] sm:$0xff] }
  0xb7   : > { %2064 = vmatmul.msk.f32.gmra.mxu1 %vm575_vm1, %v543_v46  ;;  %2082 = vmatmul.msk.f32.gmra.mxu2 %vm575_vm1, %v812_v47  ;;  %v2144_v47 = vld [vmem:[%s2787_s26 + $0x171] sm:$0xff] }
  0xb9   : > { %2116 = vmatmul.msk.f32.gmra.mxu3 %vm575_vm1, %v2098_v48 }
  0xbb   : > { %2150 = vmatmul.msk.f32.gmra.mxu0 %vm575_vm1, %v2132_v49 }
  0xbf   : > { %2065 = vmatmul.msk.f32.gmra.mxu1 %vm575_vm1, %v544_v50  ;;  %2083 = vmatmul.msk.f32.gmra.mxu2 %vm575_vm1, %v813_v51  ;;  %v2163_v51 = vld [vmem:[%s2787_s26 + $0xc2] sm:$0xff] }
  0xc1   : > { %2117 = vmatmul.msk.f32.gmra.mxu3 %vm575_vm1, %v2099_v52  ;;  %v2197_v52 = vld [vmem:[%s2787_s26 + $0x180] sm:$0xff] }
  0xc3   : > { %2151 = vmatmul.msk.f32.gmra.mxu0 %vm575_vm1, %v2133_v53  ;;  %v2231_v53 = vld [vmem:[%s2787_s26 + $0x181] sm:$0xff] }
  0xc7   : > { %2066 = vmatmul.msk.f32.gmra.mxu1 %vm575_vm1, %v545_v54  ;;  %2084 = vmatmul.msk.f32.gmra.mxu2 %vm575_vm1, %v814_v55  ;;  %v2265_v55 = vld [vmem:[%s2787_s26 + $0x182] sm:$0xff] }
  0xc9   : > { %2118 = vmatmul.msk.f32.gmra.mxu3 %vm575_vm1, %v2100_v56 }
  0xcb   : > { %2152 = vmatmul.msk.f32.gmra.mxu0 %vm575_vm1, %v2134_v57 }
  0xcf   : > { %2067 = vmatmul.msk.f32.gmra.mxu1 %vm575_vm1, %v546_v58  ;;  %2085 = vmatmul.msk.f32.gmra.mxu2 %vm575_vm1, %v815_v59 }
  0xd1   : > { %2119 = vmatmul.msk.f32.gmra.mxu3 %vm575_vm1, %v2101_v60 }
  0xd3   : > { %2153 = vmatmul.msk.f32.gmra.mxu0 %vm575_vm1, %v2135_v61  ;;  %v2164_v61 = vld [vmem:[%s2787_s26 + $0xca] sm:$0xff] }
  0xd7   : > { %2068 = vmatmul.msk.f32.gmra.mxu1 %vm575_vm1, %v547_v62  ;;  %2086 = vmatmul.msk.f32.gmra.mxu2 %vm575_vm1, %v816_v63  ;;  %v2198_v62 = vld [vmem:[%s2787_s26 + $0x188] sm:$0xff] }
  0xd9   : > { %2120 = vmatmul.msk.f32.gmra.mxu3 %vm575_vm1, %v2102_v0  ;;  %v2232_v0 = vld [vmem:[%s2787_s26 + $0x189] sm:$0xff] }
  0xdb   : > { %2154 = vmatmul.msk.f32.gmra.mxu0 %vm575_vm1, %v2136_v1 }
  0xdf   : > { %2069 = vmatmul.msk.f32.gmra.mxu1 %vm575_vm1, %v548_v2  ;;  %2087 = vmatmul.msk.f32.gmra.mxu2 %vm575_vm1, %v817_v3  ;;  %v2266_v3 = vld [vmem:[%s2787_s26 + $0x18a] sm:$0xff] }
  0xe1   : > { %2121 = vmatmul.msk.f32.gmra.mxu3 %vm575_vm1, %v2103_v4 }
  0xe3   : > { %2155 = vmatmul.msk.f32.gmra.mxu0 %vm575_vm1, %v2137_v5 }
  0xe7   : > { %2070 = vmatmul.msk.f32.gmra.mxu1 %vm575_vm1, %v549_v6  ;;  %2088 = vmatmul.msk.f32.gmra.mxu2 %vm575_vm1, %v818_v7 }
  0xe9   : > { %2122 = vmatmul.msk.f32.gmra.mxu3 %vm575_vm1, %v2104_v8 }
  0xeb   : > { %2156 = vmatmul.msk.f32.gmra.mxu0 %vm575_vm1, %v2138_v9  ;;  %v2165_v9 = vld [vmem:[%s2787_s26 + $0xda] sm:$0xff] }
  0xef   : > { %2071 = vmatmul.msk.f32.gmra.mxu1 %vm575_vm1, %v550_v10  ;;  %2089 = vmatmul.msk.f32.gmra.mxu2 %vm575_vm1, %v819_v11  ;;  %v2199_v10 = vld [vmem:[%s2787_s26 + $0x198] sm:$0xff] }
  0xf1   : > { %2123 = vmatmul.msk.f32.gmra.mxu3 %vm575_vm1, %v2105_v12  ;;  %v2233_v12 = vld [vmem:[%s2787_s26 + $0x199] sm:$0xff] }
  0xf3   : > { %2157 = vmatmul.msk.f32.gmra.mxu0 %vm575_vm1, %v2139_v13 }
  0xf7   : > { %2072 = vmatmul.msk.f32.gmra.mxu1 %vm575_vm1, %v551_v14  ;;  %2090 = vmatmul.msk.f32.gmra.mxu2 %vm575_vm1, %v820_v15  ;;  %v2267_v15 = vld [vmem:[%s2787_s26 + $0x19a] sm:$0xff] }
  0xf9   : > { %2124 = vmatmul.msk.f32.gmra.mxu3 %vm575_vm1, %v2106_v16 }
  0xfb   : > { %2158 = vmatmul.msk.f32.gmra.mxu0 %vm575_vm1, %v2140_v17 }
  0xfc   : > { %v2961_v18 = vpop.f32.mrf.mxu1 }
  0xff   : > { %2073 = vmatmul.msk.f32.gmra.mxu1 %vm575_vm1, %v552_v19  ;;  %2091 = vmatmul.msk.f32.gmra.mxu2 %vm575_vm1, %v821_v20 }
 0x100   : > { %v645_v22 = vpop.f32.mrf.mxu0 }
 0x101   : > { %2125 = vmatmul.msk.f32.gmra.mxu3 %vm575_vm1, %v2107_v21 }
 0x102   : > { %v2970_v24 = vpop.f32.mrf.mxu2 }
 0x103   : > { %2159 = vmatmul.msk.f32.gmra.mxu0 %vm575_vm1, %v2141_v23  ;;  %v2200_v23 = vld [vmem:[%s2787_s26 + $0x1a0] sm:$0xff] }
 0x104   : > { %v2973_v25 = vpop.f32.mrf.mxu1  ;;  %v2975_v26 = vpop.f32.mrf.mxu3 }
 0x107   : > { %2074 = vmatmul.msk.f32.gmra.mxu1 %vm575_vm1, %v553_v27  ;;  %2092 = vmatmul.msk.f32.gmra.mxu2 %vm575_vm1, %v822_v28  ;;  %v2234_v28 = vld [vmem:[%s2787_s26 + $0x1a1] sm:$0xff] }
 0x108   : > { %v648_v30 = vpop.f32.mrf.mxu0 }
 0x109   : > { %2126 = vmatmul.msk.f32.gmra.mxu3 %vm575_vm1, %v2108_v29 }
 0x10a   : > { %v2984_v32 = vpop.f32.mrf.mxu2 }
 0x10b   : > { %2160 = vmatmul.msk.f32.gmra.mxu0 %vm575_vm1, %v2142_v31  ;;  %v2268_v31 = vld [vmem:[%s2787_s26 + $0x1a2] sm:$0xff] }
 0x10c   : > { %v2987_v33 = vpop.f32.mrf.mxu1  ;;  %v2989_v34 = vpop.f32.mrf.mxu3 }
 0x10f   : > { %2075 = vmatmul.msk.f32.gmra.mxu1 %vm575_vm1, %v554_v35  ;;  %2093 = vmatmul.msk.f32.gmra.mxu2 %vm575_vm1, %v823_v36 }
 0x110   : > { %v651_v38 = vpop.f32.mrf.mxu0 }
 0x111   : > { %2127 = vmatmul.msk.f32.gmra.mxu3 %vm575_vm1, %v2109_v37 }
 0x112   : > { %v2998_v40 = vpop.f32.mrf.mxu2 }
 0x113   : > { %2161 = vmatmul.msk.f32.gmra.mxu0 %vm575_vm1, %v2143_v39 }
 0x114   : > { %v3001_v41 = vpop.f32.mrf.mxu1  ;;  %v3003_v42 = vpop.f32.mrf.mxu3 }
 0x117   : > { %2076 = vmatmul.msk.f32.gmra.mxu1 %vm575_vm1, %v555_v43  ;;  %2094 = vmatmul.msk.f32.gmra.mxu2 %vm575_vm1, %v824_v44  ;;  %v2167_v43 = vld [vmem:[%s2787_s26 + $0xf2] sm:$0xff] }
 0x118   : > { %v654_v46 = vpop.f32.mrf.mxu0  ;;  %v2201_v44 = vld [vmem:[%s2787_s26 + $0x1b0] sm:$0xff] }
 0x119   : > { %2128 = vmatmul.msk.f32.gmra.mxu3 %vm575_vm1, %v2110_v45 }
 0x11a   : > { %v3012_v48 = vpop.f32.mrf.mxu2 }
 0x11b   : > { %2162 = vmatmul.msk.f32.gmra.mxu0 %vm575_vm1, %v2144_v47  ;;  %v2235_v47 = vld [vmem:[%s2787_s26 + $0x1b1] sm:$0xff] }
 0x11c   : > { %v3015_v49 = vpop.f32.mrf.mxu3  ;;  %v761_v50 = vpop.f32.mrf.mxu1 }
 0x11d   : > { %v762_v56 = vadd.f32 %v761_v50, %v645_v22  ;;  %v2166_v22 = vld [vmem:[%s2787_s26 + $0xe2] sm:$0xff] }
 0x11f   : > { %2181 = vmatmul.msk.f32.vlgmr.msra.gmra.mxu1 %vm575_vm1, %v2163_v51  ;;  %2215 = vmatmul.msk.f32.vlgmr.msra.gmra.mxu2 %vm575_vm1, %v2197_v52  ;;  %v2269_v51 = vld [vmem:[%s2787_s26 + $0x1b2] sm:$0xff] }
 0x120   : > { %v1196_v54 = vpop.f32.mrf.mxu0 }
 0x121   : > { %2249 = vmatmul.msk.f32.vlgmr.msra.gmra.mxu3 %vm575_vm1, %v2231_v53 }
 0x122   : > { %v895_v57 = vpop.f32.mrf.mxu2 }
 0x123   : > { %v943_v58 = vadd.f32 %v895_v57, %v762_v56  ;;  %2283 = vmatmul.msk.f32.vlgmr.msra.gmra.mxu0 %vm575_vm1, %v2265_v55  ;;  %v2168_v57 = vld [vmem:[%s2787_s26 + $0xfa] sm:$0xff] }
 0x124   : > { %v764_v59 = vpop.f32.mrf.mxu1  ;;  %v1046_v60 = vpop.f32.mrf.mxu3 }
 0x125   : > { %v1094_v63 = vadd.f32 %v1046_v60, %v943_v58  ;;  %v765_v4 = vadd.f32 %v764_v59, %v648_v30  ;;  %v2202_v58 = vld [vmem:[%s2787_s26 + $0x1b8] sm:$0xff] }
 0x126   : > { %v2236_v60 = vld [vmem:[%s2787_s26 + $0x1b9] sm:$0xff] }
 0x127   : > { %v3028_v1 = vadd.f32 %v1196_v54, %v1094_v63  ;;  %2182 = vmatmul.msk.f32.gmra.mxu1 %vm575_vm1, %v2164_v61  ;;  %2216 = vmatmul.msk.f32.gmra.mxu2 %vm575_vm1, %v2198_v62  ;;  %v2270_v62 = vld [vmem:[%s2787_s26 + $0x1ba] sm:$0xff] }
 0x128   : > { %v1199_v2 = vpop.f32.mrf.mxu0 }
 0x129   : > { %2250 = vmatmul.msk.f32.gmra.mxu3 %vm575_vm1, %v2232_v0 }
 0x12a   : > { %v898_v5 = vpop.f32.mrf.mxu2 }
 0x12b   : > { %v944_v6 = vadd.f32 %v898_v5, %v765_v4  ;;  %2284 = vmatmul.msk.f32.gmra.mxu0 %vm575_vm1, %v2266_v3  ;;  %v2169_v5 = vld [vmem:[%s2787_s26 + $0x10a] sm:$0xff] }
 0x12c   : > { %v767_v7 = vpop.f32.mrf.mxu1  ;;  %v1049_v8 = vpop.f32.mrf.mxu3 }
 0x12d   : > { %v1095_v11 = vadd.f32 %v1049_v8, %v944_v6  ;;  %v768_v16 = vadd.f32 %v767_v7, %v651_v38  ;;  %v2203_v6 = vld [vmem:[%s2787_s26 + $0x1c8] sm:$0xff] }
 0x12e   : > { %v2237_v8 = vld [vmem:[%s2787_s26 + $0x1c9] sm:$0xff] }
 0x12f   : > { %v3038_v13 = vadd.f32 %v1199_v2, %v1095_v11  ;;  %2183 = vmatmul.msk.f32.gmra.mxu1 %vm575_vm1, %v2165_v9  ;;  %2217 = vmatmul.msk.f32.gmra.mxu2 %vm575_vm1, %v2199_v10  ;;  %v2271_v10 = vld [vmem:[%s2787_s26 + $0x1ca] sm:$0xff] }
 0x130   : > { %v1202_v14 = vpop.f32.mrf.mxu0 }
 0x131   : > { %2251 = vmatmul.msk.f32.gmra.mxu3 %vm575_vm1, %v2233_v12 }
 0x132   : > { %v901_v17 = vpop.f32.mrf.mxu2 }
 0x133   : > { %v945_v19 = vadd.f32 %v901_v17, %v768_v16  ;;  %2285 = vmatmul.msk.f32.gmra.mxu0 %vm575_vm1, %v2267_v15  ;;  %v2170_v17 = vld [vmem:[%s2787_s26 + $0x112] sm:$0xff] }
 0x134   : > { %v770_v20 = vpop.f32.mrf.mxu1  ;;  %v1052_v21 = vpop.f32.mrf.mxu3 }
 0x135   : > { %v1096_v27 = vadd.f32 %v1052_v21, %v945_v19  ;;  %v771_v35 = vadd.f32 %v770_v20, %v654_v46  ;;  %v2204_v19 = vld [vmem:[%s2787_s26 + $0x1d0] sm:$0xff] }
 0x136   : > { %v2238_v21 = vld [vmem:[%s2787_s26 + $0x1d1] sm:$0xff] }
 0x137   : > { %v3048_v29 = vadd.f32 %v1202_v14, %v1096_v27  ;;  %2184 = vmatmul.msk.f32.gmra.mxu1 %vm575_vm1, %v2166_v22  ;;  %2218 = vmatmul.msk.f32.gmra.mxu2 %vm575_vm1, %v2200_v23  ;;  %v2272_v23 = vld [vmem:[%s2787_s26 + $0x1d2] sm:$0xff] }
 0x138   : > { %v1205_v30 = vpop.f32.mrf.mxu0 }
 0x139   : > { %2252 = vmatmul.msk.f32.gmra.mxu3 %vm575_vm1, %v2234_v28 }
 0x13a   : > { %v904_v36 = vpop.f32.mrf.mxu2 }
 0x13b   : > { %v946_v37 = vadd.f32 %v904_v36, %v771_v35  ;;  %2286 = vmatmul.msk.f32.gmra.mxu0 %vm575_vm1, %v2268_v31  ;;  %v2171_v36 = vld [vmem:[%s2787_s26 + $0x122] sm:$0xff] }
 0x13c   : > { %v773_v38 = vpop.f32.mrf.mxu1  ;;  %v1055_v39 = vpop.f32.mrf.mxu3 }
 0x13d   : > { %v1097_v45 = vadd.f32 %v1055_v39, %v946_v37  ;;  %v774_v52 = vadd.f32 %v773_v38, %v2961_v18  ;;  %v2205_v37 = vld [vmem:[%s2787_s26 + $0x1e0] sm:$0xff] }
 0x13e   : > { %v2239_v39 = vld [vmem:[%s2787_s26 + $0x1e1] sm:$0xff] }
 0x13f   : > { %v3058_v50 = vadd.f32 %v1205_v30, %v1097_v45  ;;  %2185 = vmatmul.msk.f32.gmra.mxu1 %vm575_vm1, %v2167_v43  ;;  %2219 = vmatmul.msk.f32.gmra.mxu2 %vm575_vm1, %v2201_v44  ;;  %v2273_v44 = vld [vmem:[%s2787_s26 + $0x1e2] sm:$0xff] }
 0x140   : > { %v1208_v46 = vpop.f32.mrf.mxu0 }
 0x141   : > { %2253 = vmatmul.msk.f32.gmra.mxu3 %vm575_vm1, %v2235_v47 }
 0x142   : > { %v907_v53 = vpop.f32.mrf.mxu2 }
 0x143   : > { %v947_v54 = vadd.f32 %v907_v53, %v774_v52  ;;  %2287 = vmatmul.msk.f32.gmra.mxu0 %vm575_vm1, %v2269_v51  ;;  %v2172_v53 = vld [vmem:[%s2787_s26 + $0x12a] sm:$0xff] }
 0x144   : > { %v776_v55 = vpop.f32.mrf.mxu1  ;;  %v1058_v56 = vpop.f32.mrf.mxu3 }
 0x145   : > { %v1098_v59 = vadd.f32 %v1058_v56, %v947_v54  ;;  %v777_v63 = vadd.f32 %v776_v55, %v2973_v25  ;;  %v2206_v54 = vld [vmem:[%s2787_s26 + $0x1e8] sm:$0xff] }
 0x146   : > { %v2240_v56 = vld [vmem:[%s2787_s26 + $0x1e9] sm:$0xff] }
 0x147   : > { %v3069_v61 = vadd.f32 %v1208_v46, %v1098_v59  ;;  %2186 = vmatmul.msk.f32.gmra.mxu1 %vm575_vm1, %v2168_v57  ;;  %2220 = vmatmul.msk.f32.gmra.mxu2 %vm575_vm1, %v2202_v58  ;;  %v2274_v58 = vld [vmem:[%s2787_s26 + $0x1ea] sm:$0xff] }
 0x148   : > { %v1211_v18 = vpop.f32.mrf.mxu0 }
 0x149   : > { %2254 = vmatmul.msk.f32.gmra.mxu3 %vm575_vm1, %v2236_v60 }
 0x14a   : > { %v910_v0 = vpop.f32.mrf.mxu2 }
 0x14b   : > { %v948_v2 = vadd.f32 %v910_v0, %v777_v63  ;;  %2288 = vmatmul.msk.f32.gmra.mxu0 %vm575_vm1, %v2270_v62  ;;  %v2173_v0 = vld [vmem:[%s2787_s26 + $0x13a] sm:$0xff] }
 0x14c   : > { %v779_v3 = vpop.f32.mrf.mxu1  ;;  %v1061_v4 = vpop.f32.mrf.mxu3 }
 0x14d   : > { %v1099_v7 = vadd.f32 %v1061_v4, %v948_v2  ;;  %v780_v11 = vadd.f32 %v779_v3, %v2987_v33  ;;  %v2207_v2 = vld [vmem:[%s2787_s26 + $0x1f8] sm:$0xff] }
 0x14e   : > { %v2241_v4 = vld [vmem:[%s2787_s26 + $0x1f9] sm:$0xff] }
 0x14f   : > { %v3080_v9 = vadd.f32 %v1211_v18, %v1099_v7  ;;  %2187 = vmatmul.msk.f32.gmra.mxu1 %vm575_vm1, %v2169_v5  ;;  %2221 = vmatmul.msk.f32.gmra.mxu2 %vm575_vm1, %v2203_v6  ;;  %v2275_v6 = vld [vmem:[%s2787_s26 + $0x1fa] sm:$0xff] }
 0x150   : > { %v1214_v25 = vpop.f32.mrf.mxu0 }
 0x151   : > { %2255 = vmatmul.msk.f32.gmra.mxu3 %vm575_vm1, %v2237_v8 }
 0x152   : > { %v913_v12 = vpop.f32.mrf.mxu2 }
 0x153   : > { %v949_v14 = vadd.f32 %v913_v12, %v780_v11  ;;  %2289 = vmatmul.msk.f32.gmra.mxu0 %vm575_vm1, %v2271_v10  ;;  %v2174_v12 = vld [vmem:[%s2787_s26 + $0x142] sm:$0xff] }
 0x154   : > { %v782_v15 = vpop.f32.mrf.mxu1  ;;  %v1064_v16 = vpop.f32.mrf.mxu3 }
 0x155   : > { %v1100_v20 = vadd.f32 %v1064_v16, %v949_v14  ;;  %v783_v27 = vadd.f32 %v782_v15, %v3001_v41  ;;  %v2208_v14 = vld [vmem:[%s2787_s26 + $0x200] sm:$0xff] }
 0x156   : > { %v2242_v16 = vld [vmem:[%s2787_s26 + $0x201] sm:$0xff] }
 0x157   : > { %v3091_v22 = vadd.f32 %v1214_v25, %v1100_v20  ;;  %2188 = vmatmul.msk.f32.gmra.mxu1 %vm575_vm1, %v2170_v17  ;;  %2222 = vmatmul.msk.f32.gmra.mxu2 %vm575_vm1, %v2204_v19  ;;  %v2276_v19 = vld [vmem:[%s2787_s26 + $0x202] sm:$0xff] }
 0x158   : > { %v1217_v33 = vpop.f32.mrf.mxu0 }
 0x159   : > { %2256 = vmatmul.msk.f32.gmra.mxu3 %vm575_vm1, %v2238_v21 }
 0x15a   : > { %v916_v28 = vpop.f32.mrf.mxu2 }
 0x15b   : > { %v950_v30 = vadd.f32 %v916_v28, %v783_v27  ;;  %2290 = vmatmul.msk.f32.gmra.mxu0 %vm575_vm1, %v2272_v23  ;;  %v2175_v28 = vld [vmem:[%s2787_s26 + $0x152] sm:$0xff] }
 0x15c   : > { %v785_v31 = vpop.f32.mrf.mxu1  ;;  %v1067_v35 = vpop.f32.mrf.mxu3 }
 0x15d   : > { %v1101_v38 = vadd.f32 %v1067_v35, %v950_v30  ;;  %v786_v45 = vadd.f32 %v785_v31, %v2970_v24  ;;  %v2209_v30 = vld [vmem:[%s2787_s26 + $0x210] sm:$0xff] }
 0x15e   : > { %v2243_v35 = vld [vmem:[%s2787_s26 + $0x211] sm:$0xff] }
 0x15f   : > { %v3102_v43 = vadd.f32 %v1217_v33, %v1101_v38  ;;  %2189 = vmatmul.msk.f32.gmra.mxu1 %vm575_vm1, %v2171_v36  ;;  %2223 = vmatmul.msk.f32.gmra.mxu2 %vm575_vm1, %v2205_v37  ;;  %v2277_v37 = vld [vmem:[%s2787_s26 + $0x212] sm:$0xff] }
 0x160   : > { %v1220_v41 = vpop.f32.mrf.mxu0 }
 0x161   : > { %2257 = vmatmul.msk.f32.gmra.mxu3 %vm575_vm1, %v2239_v39 }
 0x162   : > { %v919_v47 = vpop.f32.mrf.mxu2 }
 0x163   : > { %v951_v46 = vadd.f32 %v919_v47, %v786_v45  ;;  %2291 = vmatmul.msk.f32.gmra.mxu0 %vm575_vm1, %v2273_v44  ;;  %v2176_v47 = vld [vmem:[%s2787_s26 + $0x15a] sm:$0xff] }
 0x164   : > { %v788_v51 = vpop.f32.mrf.mxu1  ;;  %v1070_v52 = vpop.f32.mrf.mxu3 }
 0x165   : > { %v1102_v55 = vadd.f32 %v1070_v52, %v951_v46  ;;  %v789_v59 = vadd.f32 %v788_v51, %v2984_v32  ;;  %v2210_v46 = vld [vmem:[%s2787_s26 + $0x218] sm:$0xff] }
 0x166   : > { %v2244_v52 = vld [vmem:[%s2787_s26 + $0x219] sm:$0xff] }
 0x167   : > { %v3113_v57 = vadd.f32 %v1220_v41, %v1102_v55  ;;  %2190 = vmatmul.msk.f32.gmra.mxu1 %vm575_vm1, %v2172_v53  ;;  %2224 = vmatmul.msk.f32.gmra.mxu2 %vm575_vm1, %v2206_v54  ;;  %v2278_v54 = vld [vmem:[%s2787_s26 + $0x21a] sm:$0xff] }
 0x168   : > { %v1223_v24 = vpop.f32.mrf.mxu0 }
 0x169   : > { %2258 = vmatmul.msk.f32.gmra.mxu3 %vm575_vm1, %v2240_v56 }
 0x16a   : > { %v922_v60 = vpop.f32.mrf.mxu2 }
 0x16b   : > { %v952_v18 = vadd.f32 %v922_v60, %v789_v59  ;;  %2292 = vmatmul.msk.f32.gmra.mxu0 %vm575_vm1, %v2274_v58  ;;  %v2177_v60 = vld [vmem:[%s2787_s26 + $0x16a] sm:$0xff] }
 0x16c   : > { %v791_v62 = vpop.f32.mrf.mxu1  ;;  %v1073_v63 = vpop.f32.mrf.mxu3 }
 0x16d   : > { %v1103_v3 = vadd.f32 %v1073_v63, %v952_v18  ;;  %v792_v7 = vadd.f32 %v791_v62, %v2998_v40  ;;  %v2211_v18 = vld [vmem:[%s2787_s26 + $0x228] sm:$0xff] }
 0x16e   : > { %v2245_v63 = vld [vmem:[%s2787_s26 + $0x229] sm:$0xff] }
 0x16f   : > { %v3124_v5 = vadd.f32 %v1223_v24, %v1103_v3  ;;  %2191 = vmatmul.msk.f32.gmra.mxu1 %vm575_vm1, %v2173_v0  ;;  %2225 = vmatmul.msk.f32.gmra.mxu2 %vm575_vm1, %v2207_v2  ;;  %v2279_v2 = vld [vmem:[%s2787_s26 + $0x22a] sm:$0xff] }
 0x170   : > { %v1226_v32 = vpop.f32.mrf.mxu0 }
 0x171   : > { %2259 = vmatmul.msk.f32.gmra.mxu3 %vm575_vm1, %v2241_v4 }
 0x172   : > { %v925_v8 = vpop.f32.mrf.mxu2 }
 0x173   : > { %v953_v25 = vadd.f32 %v925_v8, %v792_v7  ;;  %2293 = vmatmul.msk.f32.gmra.mxu0 %vm575_vm1, %v2275_v6  ;;  %v2178_v8 = vld [vmem:[%s2787_s26 + $0x172] sm:$0xff] }
 0x174   : > { %v794_v10 = vpop.f32.mrf.mxu1  ;;  %v1076_v11 = vpop.f32.mrf.mxu3 }
 0x175   : > { %v1104_v15 = vadd.f32 %v1076_v11, %v953_v25  ;;  %v795_v20 = vadd.f32 %v794_v10, %v3012_v48  ;;  %v2212_v25 = vld [vmem:[%s2787_s26 + $0x230] sm:$0xff] }
 0x176   : > { %v2246_v11 = vld [vmem:[%s2787_s26 + $0x231] sm:$0xff] }
 0x177   : > { %v3135_v17 = vadd.f32 %v1226_v32, %v1104_v15  ;;  %2192 = vmatmul.msk.f32.gmra.mxu1 %vm575_vm1, %v2174_v12  ;;  %2226 = vmatmul.msk.f32.gmra.mxu2 %vm575_vm1, %v2208_v14 }
 0x178   : > { %v1229_v40 = vpop.f32.mrf.mxu0 }
 0x179   : > { %2260 = vmatmul.msk.f32.gmra.mxu3 %vm575_vm1, %v2242_v16 }
 0x17a   : > { %v928_v21 = vpop.f32.mrf.mxu2 }
 0x17b   : > { %v954_v33 = vadd.f32 %v928_v21, %v795_v20  ;;  %2294 = vmatmul.msk.f32.gmra.mxu0 %vm575_vm1, %v2276_v19 }
 0x17c   : > { %v797_v23 = vpop.f32.mrf.mxu1  ;;  %v1079_v27 = vpop.f32.mrf.mxu3 }
 0x17d   : > { %v1105_v31 = vadd.f32 %v1079_v27, %v954_v33  ;;  %v798_v38 = vadd.f32 %v797_v23, %v2975_v26 }
 0x17f   : > { %v3146_v36 = vadd.f32 %v1229_v40, %v1105_v31  ;;  %2193 = vmatmul.msk.f32.gmra.mxu1 %vm575_vm1, %v2175_v28  ;;  %2227 = vmatmul.msk.f32.gmra.mxu2 %vm575_vm1, %v2209_v30 }
 0x180   : > { %v1232_v48 = vpop.f32.mrf.mxu0 }
 0x181   : > { %2261 = vmatmul.msk.f32.gmra.mxu3 %vm575_vm1, %v2243_v35 }
 0x182   : > { %v931_v39 = vpop.f32.mrf.mxu2 }
 0x183   : > { %v955_v41 = vadd.f32 %v931_v39, %v798_v38  ;;  %2295 = vmatmul.msk.f32.gmra.mxu0 %vm575_vm1, %v2277_v37 }
 0x184   : > { %v800_v44 = vpop.f32.mrf.mxu1  ;;  %v1082_v45 = vpop.f32.mrf.mxu3 }
 0x185   : > { %v1106_v51 = vadd.f32 %v1082_v45, %v955_v41  ;;  %v801_v55 = vadd.f32 %v800_v44, %v2989_v34 }
 0x187   : > { %v3157_v53 = vadd.f32 %v1232_v48, %v1106_v51  ;;  %2194 = vmatmul.msk.f32.gmra.mxu1 %vm575_vm1, %v2176_v47  ;;  %2228 = vmatmul.msk.f32.gmra.mxu2 %vm575_vm1, %v2210_v46 }
 0x188   : > { %v1235_v26 = vpop.f32.mrf.mxu0 }
 0x189   : > { %2262 = vmatmul.msk.f32.gmra.mxu3 %vm575_vm1, %v2244_v52 }
 0x18a   : > { %v934_v56 = vpop.f32.mrf.mxu2 }
 0x18b   : > { %v956_v24 = vadd.f32 %v934_v56, %v801_v55  ;;  %2296 = vmatmul.msk.f32.gmra.mxu0 %vm575_vm1, %v2278_v54 }
 0x18c   : > { %v803_v58 = vpop.f32.mrf.mxu1  ;;  %v1085_v59 = vpop.f32.mrf.mxu3 }
 0x18d   : > { %v1107_v62 = vadd.f32 %v1085_v59, %v956_v24  ;;  %v804_v3 = vadd.f32 %v803_v58, %v3003_v42  ;;  %v2280_v42 = vld [vmem:[%s2787_s26 + $0x232] sm:$0xff] }
 0x18f   : > { %v3168_v0 = vadd.f32 %v1235_v26, %v1107_v62  ;;  %2195 = vmatmul.msk.f32.gmra.mxu1 %vm575_vm1, %v2177_v60  ;;  %2229 = vmatmul.msk.f32.gmra.mxu2 %vm575_vm1, %v2211_v18 }
 0x190   : > { %v1238_v34 = vpop.f32.mrf.mxu0 }
 0x191   : > { %2263 = vmatmul.msk.f32.gmra.mxu3 %vm575_vm1, %v2245_v63 }
 0x192   : > { %v937_v4 = vpop.f32.mrf.mxu2 }
 0x193   : > { %v957_v32 = vadd.f32 %v937_v4, %v804_v3  ;;  %2297 = vmatmul.msk.f32.gmra.mxu0 %vm575_vm1, %v2279_v2 }
 0x194   : > { %v806_v6 = vpop.f32.mrf.mxu1  ;;  %v1088_v7 = vpop.f32.mrf.mxu3 }
 0x195   : > { %v1108_v10 = vadd.f32 %v1088_v7, %v957_v32  ;;  %v807_v15 = vadd.f32 %v806_v6, %v3015_v49 }
 0x197   : > { %v3179_v12 = vadd.f32 %v1238_v34, %v1108_v10  ;;  %2196 = vmatmul.msk.f32.gmra.mxu1 %vm575_vm1, %v2178_v8  ;;  %2230 = vmatmul.msk.f32.gmra.mxu2 %vm575_vm1, %v2212_v25 }
 0x198   : > { %v1241_v14 = vpop.f32.mrf.mxu0 }
 0x199   : > { %2264 = vmatmul.msk.f32.gmra.mxu3 %vm575_vm1, %v2246_v11 }
 0x19a   : > { %v940_v16 = vpop.f32.mrf.mxu2 }
 0x19b   : > { %v958_v40 = vadd.f32 %v940_v16, %v807_v15  ;;  %2298 = vmatmul.msk.f32.gmra.mxu0 %vm575_vm1, %v2280_v42 }
 0x19c   : > { %v1091_v19 = vpop.f32.mrf.mxu3  ;;  %v1346_v20 = vpop.f32.mrf.mxu1 }
 0x19d   : > { %v1109_v21 = vadd.f32 %v1091_v19, %v958_v40  ;;  %v1394_v33 = vadd.f32 %v1346_v20, %v3028_v1 }
 0x19f   : > { %v3188_v23 = vadd.f32 %v1241_v14, %v1109_v21 }
 0x1a0   : > { %v1797_v27 = vpop.f32.mrf.mxu0 }
 0x1a2   : > { %v1497_v28 = vpop.f32.mrf.mxu2 }
 0x1a3   : > { %v1545_v30 = vadd.f32 %v1497_v28, %v1394_v33 }
 0x1a4   : > { %v1349_v31 = vpop.f32.mrf.mxu1  ;;  %v1647_v35 = vpop.f32.mrf.mxu3 }
 0x1a5   : > { %v1395_v49 = vadd.f32 %v1349_v31, %v3038_v13  ;;  %v1695_v48 = vadd.f32 %v1647_v35, %v1545_v30 }
 0x1a7   : > { %v1845_v37 = vadd.f32 %v1797_v27, %v1695_v48 }
 0x1a8   : > { %v1800_v38 = vpop.f32.mrf.mxu0 }
 0x1a9   : > { %v1861_v52 = vmax.f32 %v1845_v37, 0.0 }
 0x1aa   : > { %v1500_v39 = vpop.f32.mrf.mxu2 }
 0x1ab   : > { %v1546_v41 = vadd.f32 %v1500_v39, %v1395_v49 }
 0x1ac   : > { %v1352_v44 = vpop.f32.mrf.mxu1  ;;  %v1650_v45 = vpop.f32.mrf.mxu3 }
 0x1ad   : > { %v1396_v47 = vadd.f32 %v1352_v44, %v3048_v29  ;;  %v1696_v46 = vadd.f32 %v1650_v45, %v1546_v41 }
 0x1af   : > { %v1846_v1 = vadd.f32 %v1800_v38, %v1696_v46 }
 0x1b0   : > { %v1803_v51 = vpop.f32.mrf.mxu0 }
 0x1b1   : > { %v1862_v26 = vmax.f32 %v1846_v1, 0.0 }
 0x1b2   : > { %v1503_v54 = vpop.f32.mrf.mxu2 }
 0x1b3   : > { %v1878_v55 = vadd.f32 %v1862_v26, %v1861_v52  ;;  %v1547_v56 = vadd.f32 %v1503_v54, %v1396_v47 }
 0x1b4   : > { %v1355_v24 = vpop.f32.mrf.mxu1  ;;  %v1653_v58 = vpop.f32.mrf.mxu3 }
 0x1b5   : > { %v1397_v13 = vadd.f32 %v1355_v24, %v3058_v50  ;;  %v1697_v59 = vadd.f32 %v1653_v58, %v1547_v56 }
 0x1b7   : > { %v1847_v60 = vadd.f32 %v1803_v51, %v1697_v59 }
 0x1b8   : > { %v1806_v18 = vpop.f32.mrf.mxu0 }
 0x1b9   : > { %v1863_v62 = vmax.f32 %v1847_v60, 0.0 }
 0x1ba   : > { %v1506_v63 = vpop.f32.mrf.mxu2 }
 0x1bb   : > { %v1879_v34 = vadd.f32 %v1878_v55, %v1863_v62  ;;  %v1548_v2 = vadd.f32 %v1506_v63, %v1397_v13 }
 0x1bc   : > { %v1358_v29 = vpop.f32.mrf.mxu1  ;;  %v1656_v3 = vpop.f32.mrf.mxu3 }
 0x1bd   : > { %v1398_v4 = vadd.f32 %v1358_v29, %v3069_v61  ;;  %v1698_v32 = vadd.f32 %v1656_v3, %v1548_v2 }
 0x1bf   : > { %v1848_v6 = vadd.f32 %v1806_v18, %v1698_v32 }
 0x1c0   : > { %v1809_v7 = vpop.f32.mrf.mxu0 }
 0x1c1   : > { %v1864_v8 = vmax.f32 %v1848_v6, 0.0 }
 0x1c2   : > { %v1509_v25 = vpop.f32.mrf.mxu2 }
 0x1c3   : > { %v1880_v10 = vadd.f32 %v1879_v34, %v1864_v8  ;;  %v1549_v11 = vadd.f32 %v1509_v25, %v1398_v4 }
 0x1c4   : > { %v1361_v14 = vpop.f32.mrf.mxu1  ;;  %v1659_v50 = vpop.f32.mrf.mxu3 }
 0x1c5   : > { %v1699_v42 = vadd.f32 %v1659_v50, %v1549_v11  ;;  %v1399_v40 = vadd.f32 %v1361_v14, %v3080_v9 }
 0x1c7   : > { %v1849_v15 = vadd.f32 %v1809_v7, %v1699_v42 }
 0x1c8   : > { %v1812_v16 = vpop.f32.mrf.mxu0 }
 0x1c9   : > { %v1865_v19 = vmax.f32 %v1849_v15, 0.0 }
 0x1ca   : > { %v1512_v20 = vpop.f32.mrf.mxu2 }
 0x1cb   : > { %v1881_v21 = vadd.f32 %v1880_v10, %v1865_v19  ;;  %v1550_v33 = vadd.f32 %v1512_v20, %v1399_v40 }
 0x1cc   : > { %v1364_v27 = vpop.f32.mrf.mxu1  ;;  %v1662_v61 = vpop.f32.mrf.mxu3 }
 0x1cd   : > { %v1700_v28 = vadd.f32 %v1662_v61, %v1550_v33  ;;  %v1400_v35 = vadd.f32 %v1364_v27, %v3091_v22 }
 0x1cf   : > { %v1850_v30 = vadd.f32 %v1812_v16, %v1700_v28 }
 0x1d0   : > { %v1815_v31 = vpop.f32.mrf.mxu0 }
 0x1d1   : > { %v1866_v49 = vmax.f32 %v1850_v30, 0.0 }
 0x1d2   : > { %v1515_v48 = vpop.f32.mrf.mxu2 }
 0x1d3   : > { %v1882_v37 = vadd.f32 %v1881_v21, %v1866_v49  ;;  %v1551_v38 = vadd.f32 %v1515_v48, %v1400_v35 }
 0x1d4   : > { %v1367_v39 = vpop.f32.mrf.mxu1  ;;  %v1665_v41 = vpop.f32.mrf.mxu3 }
 0x1d5   : > { %v1701_v44 = vadd.f32 %v1665_v41, %v1551_v38  ;;  %v1401_v47 = vadd.f32 %v1367_v39, %v3102_v43 }
 0x1d7   : > { %v1851_v45 = vadd.f32 %v1815_v31, %v1701_v44 }
 0x1d8   : > { %v1818_v9 = vpop.f32.mrf.mxu0 }
 0x1d9   : > { %v1867_v46 = vmax.f32 %v1851_v45, 0.0 }
 0x1da   : > { %v1518_v1 = vpop.f32.mrf.mxu2 }
 0x1db   : > { %v1883_v51 = vadd.f32 %v1882_v37, %v1867_v46  ;;  %v1552_v52 = vadd.f32 %v1518_v1, %v1401_v47 }
 0x1dc   : > { %v1370_v26 = vpop.f32.mrf.mxu1  ;;  %v1668_v54 = vpop.f32.mrf.mxu3 }
 0x1dd   : > { %v1702_v55 = vadd.f32 %v1668_v54, %v1552_v52  ;;  %v1402_v24 = vadd.f32 %v1370_v26, %v3113_v57 }
 0x1df   : > { %v1852_v56 = vadd.f32 %v1818_v9, %v1702_v55 }
 0x1e0   : > { %v1821_v22 = vpop.f32.mrf.mxu0 }
 0x1e1   : > { %v1868_v58 = vmax.f32 %v1852_v56, 0.0 }
 0x1e2   : > { %v1521_v13 = vpop.f32.mrf.mxu2 }
 0x1e3   : > { %v1884_v59 = vadd.f32 %v1883_v51, %v1868_v58  ;;  %v1553_v60 = vadd.f32 %v1521_v13, %v1402_v24 }
 0x1e4   : > { %v1373_v18 = vpop.f32.mrf.mxu1  ;;  %v1671_v62 = vpop.f32.mrf.mxu3 }
 0x1e5   : > { %v1703_v63 = vadd.f32 %v1671_v62, %v1553_v60  ;;  %v1403_v2 = vadd.f32 %v1373_v18, %v3124_v5 }
 0x1e7   : > { %v1853_v34 = vadd.f32 %v1821_v22, %v1703_v63 }
 0x1e8   : > { %v1824_v43 = vpop.f32.mrf.mxu0 }
 0x1e9   : > { %v1869_v29 = vmax.f32 %v1853_v34, 0.0 }
 0x1ea   : > { %v1524_v3 = vpop.f32.mrf.mxu2 }
 0x1eb   : > { %v1885_v4 = vadd.f32 %v1884_v59, %v1869_v29  ;;  %v1554_v32 = vadd.f32 %v1524_v3, %v1403_v2 }
 0x1ec   : > { %v1376_v6 = vpop.f32.mrf.mxu1  ;;  %v1674_v7 = vpop.f32.mrf.mxu3 }
 0x1ed   : > { %v1704_v8 = vadd.f32 %v1674_v7, %v1554_v32  ;;  %v1404_v10 = vadd.f32 %v1376_v6, %v3135_v17 }
 0x1ef   : > { %v1854_v25 = vadd.f32 %v1824_v43, %v1704_v8 }
 0x1f0   : > { %v1827_v57 = vpop.f32.mrf.mxu0 }
 0x1f1   : > { %v1870_v11 = vmax.f32 %v1854_v25, 0.0 }
 0x1f2   : > { %v1527_v14 = vpop.f32.mrf.mxu2 }
 0x1f3   : > { %v1886_v50 = vadd.f32 %v1885_v4, %v1870_v11  ;;  %v1555_v42 = vadd.f32 %v1527_v14, %v1404_v10  ;;  %v1877_v14 = vld [vmem:[#allocation2] sm:$0x1] }
 0x1f4   : > { %v1379_v15 = vpop.f32.mrf.mxu1  ;;  %v1677_v16 = vpop.f32.mrf.mxu3 }
 0x1f5   : > { %v1705_v40 = vadd.f32 %v1677_v16, %v1555_v42  ;;  %v1405_v20 = vadd.f32 %v1379_v15, %v3146_v36 }
 0x1f7   : > { %v1855_v19 = vadd.f32 %v1827_v57, %v1705_v40 }
 0x1f8   : > { %v1830_v5 = vpop.f32.mrf.mxu0 }
 0x1f9   : > { %v1871_v21 = vmax.f32 %v1855_v19, 0.0 }
 0x1fa   : > { %v1530_v33 = vpop.f32.mrf.mxu2 }
 0x1fb   : > { %v1887_v27 = vadd.f32 %v1886_v50, %v1871_v21  ;;  %v1556_v61 = vadd.f32 %v1530_v33, %v1405_v20 }
 0x1fc   : > { %v1382_v28 = vpop.f32.mrf.mxu1  ;;  %v1680_v30 = vpop.f32.mrf.mxu3 }
 0x1fd   : > { %v1706_v31 = vadd.f32 %v1680_v30, %v1556_v61  ;;  %v1406_v49 = vadd.f32 %v1382_v28, %v3157_v53 }
 0x1ff   : > { %v1856_v35 = vadd.f32 %v1830_v5, %v1706_v31 }
 0x200   : > { %v1833_v17 = vpop.f32.mrf.mxu0 }
 0x201   : > { %v1872_v48 = vmax.f32 %v1856_v35, 0.0 }
 0x202   : > { %v1533_v37 = vpop.f32.mrf.mxu2 }
 0x203   : > { %v1888_v38 = vadd.f32 %v1887_v27, %v1872_v48  ;;  %v1557_v39 = vadd.f32 %v1533_v37, %v1406_v49 }
 0x204   : > { %v1385_v41 = vpop.f32.mrf.mxu1  ;;  %v1683_v44 = vpop.f32.mrf.mxu3 }
 0x205   : > { %v1707_v45 = vadd.f32 %v1683_v44, %v1557_v39  ;;  %v1407_v47 = vadd.f32 %v1385_v41, %v3168_v0 }
 0x207   : > { %v1857_v9 = vadd.f32 %v1833_v17, %v1707_v45 }
 0x208   : > { %v1836_v36 = vpop.f32.mrf.mxu0 }
 0x209   : > { %v1873_v46 = vmax.f32 %v1857_v9, 0.0 }
 0x20a   : > { %v1536_v1 = vpop.f32.mrf.mxu2 }
 0x20b   : > { %v1889_v51 = vadd.f32 %v1888_v38, %v1873_v46  ;;  %v1558_v52 = vadd.f32 %v1536_v1, %v1407_v47 }
 0x20c   : > { %v1388_v26 = vpop.f32.mrf.mxu1  ;;  %v1686_v54 = vpop.f32.mrf.mxu3 }
 0x20d   : > { %v1708_v55 = vadd.f32 %v1686_v54, %v1558_v52  ;;  %v1408_v53 = vadd.f32 %v1388_v26, %v3179_v12 }
 0x20f   : > { %v1858_v56 = vadd.f32 %v1836_v36, %v1708_v55 }
 0x210   : > { %v1839_v58 = vpop.f32.mrf.mxu0 }
 0x211   : > { %v1874_v22 = vmax.f32 %v1858_v56, 0.0 }
 0x212   : > { %v1539_v24 = vpop.f32.mrf.mxu2 }
 0x213   : > { %v1890_v13 = vadd.f32 %v1889_v51, %v1874_v22  ;;  %v1559_v59 = vadd.f32 %v1539_v24, %v1408_v53 }
 0x214   : > { %v1689_v60 = vpop.f32.mrf.mxu3  ;;  %v1391_v62 = vpop.f32.mrf.mxu1 }
 0x215   : > { %v1709_v18 = vadd.f32 %v1689_v60, %v1559_v59  ;;  %v1409_v0 = vadd.f32 %v1391_v62, %v3188_v23 }
 0x217   : > { %v1859_v63 = vadd.f32 %v1839_v58, %v1709_v18 }
 0x218   : > { %v1842_v4 = vpop.f32.mrf.mxu0 }
 0x219   : > { %v1875_v34 = vmax.f32 %v1859_v63, 0.0 }
 0x21a   : > { %v1542_v43 = vpop.f32.mrf.mxu2 }
 0x21b   : > { %v1891_v2 = vadd.f32 %v1890_v13, %v1875_v34  ;;  %v1560_v29 = vadd.f32 %v1542_v43, %v1409_v0 }
 0x21c   : > { %v1692_v3 = vpop.f32.mrf.mxu3 }
 0x21d   : > { %v1710_v32 = vadd.f32 %v1692_v3, %v1560_v29 }
 0x21f   : > { %v1860_v6 = vadd.f32 %v1842_v4, %v1710_v32 }
 0x221   : > { %v1876_v12 = vmax.f32 %v1860_v6, 0.0 }
 0x223   : > { %v1892_v7 = vadd.f32 %v1891_v2, %v1876_v12 }
 0x225   : > { %v1893_v8 = vrot.slane %v1892_v7, 4 }
 0x227   : > { %v1894_v25 = vadd.f32 %v1893_v8, %v1892_v7 }
 0x229   : > { %v1895_v57 = vrot.slane %v1894_v25, 2 }
 0x22b   : > { %v1896_v10 = vadd.f32 %v1895_v57, %v1894_v25 }
 0x22d   : > { %v1897_v11 = vrot.slane %v1896_v10, 1 }
 0x22f   : > { %v1898_v50 = vadd.f32 %v1897_v11, %v1896_v10  ;;  %1904 = sbr.rel (%p2299_p4) target bundleno = 725 (0x2d5), region = 82 }
 0x231   : > { %v1899_v42 = vadd.f32 %v1898_v50, %v1877_v14 }
 0x233   : > { %1900 = vst [vmem:[#allocation2] sm:$0x1] %v1899_v42 }
 0x234   : > { %v1922_v23 = vld [vmem:[%s3311_s2 + $0x78] sm:$0xff]  ;;  %v1921_v15 = vld [vmem:[%s3311_s2 + $0x70] sm:$0xff]  ;;  %v1920_v16 = vld [vmem:[%s3311_s2 + $0x68] sm:$0xff] }
 0x235   : > { %1924 = vmatpush.msra.mxu0 %v1922_v23  ;;  %v1919_v40 = vld [vmem:[%s3311_s2 + $0x60] sm:$0xff]  ;;  %v1918_v19 = vld [vmem:[%s3311_s2 + $0x58] sm:$0xff]  ;;  %v1917_v5 = vld [vmem:[%s3311_s2 + $0x50] sm:$0xff] }
 0x236   : > { %v1916_v20 = vld [vmem:[%s3311_s2 + $0x48] sm:$0xff]  ;;  %v1915_v21 = vld [vmem:[%s3311_s2 + $0x40] sm:$0xff]  ;;  %v1914_v33 = vld [vmem:[%s3311_s2 + $0x38] sm:$0xff] }
 0x237   : > { %1925 = vmatpush.msra.mxu0 %v1921_v15  ;;  %v1913_v27 = vld [vmem:[%s3311_s2 + $0x30] sm:$0xff]  ;;  %v1912_v61 = vld [vmem:[%s3311_s2 + $0x28] sm:$0xff]  ;;  %v1911_v28 = vld [vmem:[%s3311_s2 + $0x20] sm:$0xff] }
 0x238   : > { %v1910_v30 = vld [vmem:[%s3311_s2 + $0x18] sm:$0xff]  ;;  %v1909_v31 = vld [vmem:[%s3311_s2 + $0x10] sm:$0xff]  ;;  %v1908_v17 = vld [vmem:[%s3311_s2 + $0x8] sm:$0xff] }
 0x239   : > { %1926 = vmatpush.msra.mxu0 %v1920_v16  ;;  %v1907_v49 = vld [vmem:[%s3311_s2] sm:$0xff] }
 0x23a   : > { %v1905_v35 = vld [vmem:[#allocation2] sm:$0x1] }
 0x23b   : > { %1927 = vmatpush.msra.mxu0 %v1919_v40  ;;  %v1906_v48 = vmul.f32 0.00390625, %v1905_v35  ;;  %v1923_v37 = vld [vmem:[%s3312_s3] sm:$0x1] }
 0x23d   : > { %1928 = vmatpush.msra.mxu0 %v1918_v19 }
 0x23f   : > { %1929 = vmatpush.msra.mxu0 %v1917_v5 }
 0x241   : > { %1930 = vmatpush.msra.mxu0 %v1916_v20 }
 0x243   : > { %1931 = vmatpush.msra.mxu0 %v1915_v21 }
 0x245   : > { %1932 = vmatpush.msra.mxu0 %v1914_v33 }
 0x247   : > { %1933 = vmatpush.msra.mxu0 %v1913_v27 }
 0x249   : > { %1934 = vmatpush.msra.mxu0 %v1912_v61 }
 0x24b   : > { %1935 = vmatpush.msra.mxu0 %v1911_v28 }
 0x24d   : > { %1936 = vmatpush.msra.mxu0 %v1910_v30 }
 0x24f   : > { %1937 = vmatpush.msra.mxu0 %v1909_v31 }
 0x251   : > { %1938 = vmatpush.msra.mxu0 %v1908_v17 }
 0x253   : > { %1939 = vmatpush.msra.mxu0 %v1907_v49 }
 0x254   : > { %1940 = vmatmul.f32.vlgmr.msra.gmra.mxu0 %v1906_v48 }
 0x2d1   : > { %v1941_v38 = vpop.f32.mrf.mxu0 }
 0x2d2   : > { %v1942_v39 = vadd.f32 %v1941_v38, %v1923_v37 }
 0x2d4   : > { %1944 = vst [vmem:[%s2791_s30] sm:$0x1] %v1942_v39 }
 0x2d5 PF: > { %s1954_s25 = scalar_lea.hbm %s3313_s4, %s2496_s21  ;;  %s1956_s8 = sshll.u32 %s2791_s30, 4  ;;  %s1957_s8 = int_to_ptr.vmem [resolvable:$true] %s1956_s8 }
 0x2d6   : > { %s1958_s20 = sshll.u32 %s1954_s25, 4  ;;  %s1946_s9 = scalar_lea.sflag [#allocation5], %s531_s14  ;;  %s1959_s20 = int_to_ptr.hbm [resolvable:$true] %s1958_s20 }
 0x2d7   : > { %s2412_s26 = sshra.s32 %s1959_s20, 4  ;;  %s2418_s5 = scalar_lea.hbm %s3313_s4, 2  ;;  %s2413_s26 = int_to_ptr.hbm [resolvable:$true] %s2412_s26 }
 0x2d8   : > { %s2414_s18 = scalar_lea.hbm %s2413_s26, 1  ;;  %p2419_p9 = scmp.lt.s32.totalorder %s2413_s26, %s3313_s4 }
 0x2d9   : > { %p2415_p5 = scmp.ne.s32.totalorder %s2413_s26, %s2414_s18  ;;  %p2420_p10 = scmp.lt.s32.totalorder %s2418_s5, %s2414_s18 }
 0x2db   : > { %p2416_p6 = pnand %p2415_p5, %p2608_p7  ;;  %p2421_p11 = por %p2420_p10, %p2419_p9 }
 0x2dd   : > { %p2417_p8 = pneg %p2416_p6 }
 0x2df   : > { %p2422_p13 = pnand %p2421_p11, %p2417_p8 }
 0x2e1   : > { %2425 = shalt.err (!%p2422_p13)
}
 0x2e2   : > { %2309 = dma.vmem_to_hbm [thread:$0]  (%p2608_p7), %s1957_s8, 16, %s1959_s20, %s1946_s9  }
 0x2e3 PF: > { %p2316_p0 = scmp.ge.s32.totalorder %s2508_s24, 2  ;;  %s1970_s21 = sand.u32 1, %s2472_s15  }
 0x2e4   : > { %s1971_s14 = scalar_lea.sflag [#allocation5], %s1970_s21 }
 0x2e5   : > { %p2312_p1 = pnand %p2316_p0, %p2616_p12 }
 0x2e7   : > { %p2313_p2 = pneg %p2312_p1 }
 0x2e9   : > { %2467 = dma.done.wait (%p2313_p2), %s1971_s14, 16  }
 0x2ea   : > { %2469 = vsyncadd (%p2313_p2), %s1971_s14, 4294967280  ;;  %s17_s24 = sadd.s32 1, %s2508_s24   ;;  %s3319_s15 = smov %s2476_s16 }
 0x2eb   : > { %p14_p3 = scmp.ge.s32.totalorder %s17_s24, 6   ;;  %s3320_s16 = smov %s2480_s17 }
 0x2ec   : > { %s3321_s17 = smov %s2621_s11  ;;  %s3322_s18 = smov %s2488_s19 }
 0x2ed   : > { %s3323_s19 = smov %s2624_s12  ;;  %s3324_s20 = smov %s2500_s22 }
 0x2ee   : > { %s3325_s21 = smov %s2504_s23  ;;  %s3326_s22 = smov %s3329_s27 }
 0x2ef   : > { %s3327_s23 = smov %s3333_s28  ;;  %16 = sbr.rel (!%p14_p3) target bundleno = 8 (0x8), region = 132 }
 0x2f4   :  { %1976 = vsyncpa [#allocation5], 1 }
 0x2f5   :  { %1978 = vsyncpa [#allocation5 + $0x1], 1 }

</bundles_post_ra>
